<compile_context>
chip_gen: v7x
topology: tpu7x:2x2x1
jax: 0.10.0
libtpu: 0.0.40
codegen_flags: <defaults>
</compile_context>

<pallas_src>
import jax
import jax.numpy as jnp
from jax import lax
from jax.experimental import pallas as pl
from jax.experimental.pallas import tpu as pltpu


def lstm_net_kernel(x_ref, wih1_ref, whh1_ref, b1_ref, wih2_ref, whh2_ref,
                    b2_ref, wlin_ref, blin_ref, out_ref, xw1_ref):
    """x_ref: (T*B, D) time-major-flattened input.

    Packed weight layout (see pack_kernel_params): wih1 (D, 4H), whh1/wih2/whh2 (H, 4H),
    b1/b2 (1, 4H); gate column order [i | f | g | o]; i/f/o columns (and their bias
    entries) are pre-scaled by 0.5 so the in-kernel sigmoid is an affine of one tanh.
    """
    B = out_ref.shape[0]
    T = x_ref.shape[0] // B
    H = whh1_ref.shape[0]

    whh1 = whh1_ref[...]          # (H, 4H)
    wih2 = wih2_ref[...]          # (H, 4H)
    whh2 = whh2_ref[...]          # (H, 4H)
    b2 = b2_ref[...]              # (1, 4H)

    # Hoisted layer-1 input projection with b1 folded in: one big MXU matmul + one
    # one-time VPU add instead of T small ops on the serial recurrence.
    xw1_ref[...] = (jnp.dot(x_ref[...], wih1_ref[...],
                            preferred_element_type=jnp.float32)
                    + b1_ref[...])

    def gate_act(gates):
        # Single EUP push over the packed (B, 4H) gate block. i/f/o columns were
        # pre-scaled by 0.5 at pack time, so sigmoid(v) == 0.5*tanh(v/2)+0.5 becomes a
        # plain affine on the tanh output; the g block stays a raw tanh.
        t_all = jnp.tanh(gates)
        i = 0.5 * t_all[:, 0 * H:1 * H] + 0.5
        f = 0.5 * t_all[:, 1 * H:2 * H] + 0.5
        g = t_all[:, 2 * H:3 * H]
        o = 0.5 * t_all[:, 3 * H:4 * H] + 0.5
        return i, f, g, o

    def combine(gates, c):
        i, f, g, o = gate_act(gates)
        c_new = f * c + i * g            # VPU
        return o * jnp.tanh(c_new), c_new

    def combine_first(gates):
        # Step-0 specialization: c == 0 so the f*c term (and the f gate) is dropped.
        t_all = jnp.tanh(gates)
        i = 0.5 * t_all[:, 0 * H:1 * H] + 0.5
        g = t_all[:, 2 * H:3 * H]
        o = 0.5 * t_all[:, 3 * H:4 * H] + 0.5
        c_new = i * g
        return o * jnp.tanh(c_new), c_new

    # ---- Peeled step 0: zero initial state -> no recurrent matmuls, no f*c. ----
    gates1_0 = xw1_ref[pl.ds(0, B), :]                    # bias already folded in
    h1, c1 = combine_first(gates1_0)
    gates2_0 = jnp.dot(h1, wih2, preferred_element_type=jnp.float32) + b2
    h2, c2 = combine_first(gates2_0)

    # ---- Steps 1..T-1: only the recurrent matmuls remain inside the loop. ----
    def step(t, carry):
        h1, c1, h2, c2 = carry
        row = pl.multiple_of(t * B, B)                    # sublane-aligned block
        gates1 = (xw1_ref[pl.ds(row, B), :]
                  + jnp.dot(h1, whh1, preferred_element_type=jnp.float32))
        h1, c1 = combine(gates1, c1)
        # TODO(synk): nn.LSTM dropout=0.5 between layers is training-only; inference no-op.
        gates2 = (jnp.dot(h1, wih2, preferred_element_type=jnp.float32)
                  + jnp.dot(h2, whh2, preferred_element_type=jnp.float32)
                  + b2)
        h2, c2 = combine(gates2, c2)
        return h1, c1, h2, c2

    # T is small and static: full unroll gives the LLO scheduler cross-step visibility.
    h1, c1, h2, c2 = lax.fori_loop(1, T, step, (h1, c1, h2, c2), unroll=True)

    # lstm_out.squeeze()[:, -1, :] == last-timestep hidden of the top layer (batch > 1
    # semantics, as in the PyTorch module), then Linear(hidden_dim, 1).
    # VPU multiply + XLU lane reduction; (B,1) masked store is a negligible one-time cost.
    out_ref[...] = (jnp.sum(h2 * wlin_ref[...], axis=-1, keepdims=True)
                    + blin_ref[...])


def lstm_net_forward(x, kparams):
    """x: (B, T, D) batch_first float32 -> (B, 1) predictions."""
    B, T, D = x.shape
    H = kparams["whh1"].shape[0]
    # Time-major + flatten so each timestep of the hoisted projection is a contiguous,
    # sublane-aligned block of B rows.
    x_tm = jnp.transpose(x, (1, 0, 2)).reshape(T * B, D)
    args = (x_tm, kparams["wih1"], kparams["whh1"], kparams["b1"],
            kparams["wih2"], kparams["whh2"], kparams["b2"],
            kparams["wlin"], kparams["blin"])
    vmem = pl.BlockSpec(memory_space=pltpu.MemorySpace.VMEM)
    return pl.pallas_call(
        lstm_net_kernel,
        out_shape=jax.ShapeDtypeStruct((B, 1), jnp.float32),
        in_specs=[vmem] * len(args),
        out_specs=vmem,
        scratch_shapes=[pltpu.VMEM((T * B, 4 * H), jnp.float32)],  # hoisted projection
    )(*args)


def init_params(key, input_dim, hidden_dim):
    """Deterministic init matching PyTorch shapes: LSTM layer-0 / layer-1 + Linear(H, 1)."""
    bound = 1.0 / float(hidden_dim) ** 0.5
    ks = jax.random.split(key, 10)

    def u(k, shape):
        return jax.random.uniform(k, shape, jnp.float32, -bound, bound)

    H, D = hidden_dim, input_dim
    return {
        "wih1": u(ks[0], (4 * H, D)), "whh1": u(ks[1], (4 * H, H)),
        "bih1": u(ks[2], (4 * H,)), "bhh1": u(ks[3], (4 * H,)),
        "wih2": u(ks[4], (4 * H, H)), "whh2": u(ks[5], (4 * H, H)),
        "bih2": u(ks[6], (4 * H,)), "bhh2": u(ks[7], (4 * H,)),
        "wlin": u(ks[8], (1, H)), "blin": u(ks[9], (1,)),
    }


def pack_kernel_params(raw):
    """Pre-transpose to [in, 4H], sum the two bias vectors, and fold sigmoid's x/2
    pre-scale into the i/f/o gate columns (gate order [i|f|g|o]); no per-gate padding —
    all 4 gates share one 4H-wide block (exactly 128 lanes at H=32)."""
    H = raw["whh1"].shape[1]
    col_scale = jnp.concatenate([
        jnp.full((H,), 0.5, jnp.float32),   # i
        jnp.full((H,), 0.5, jnp.float32),   # f
        jnp.ones((H,), jnp.float32),        # g (tanh gate: unscaled)
        jnp.full((H,), 0.5, jnp.float32),   # o
    ])

    def prep(w):  # torch (4H, K) -> (K, 4H) with per-column pre-scale
        return w.T * col_scale[None, :]

    return {
        "wih1": prep(raw["wih1"]),                                     # (D, 4H)
        "whh1": prep(raw["whh1"]),                                     # (H, 4H)
        "b1": ((raw["bih1"] + raw["bhh1"]) * col_scale).reshape(1, 4 * H),
        "wih2": prep(raw["wih2"]),                                     # (H, 4H)
        "whh2": prep(raw["whh2"]),                                     # (H, 4H)
        "b2": ((raw["bih2"] + raw["bhh2"]) * col_scale).reshape(1, 4 * H),
        "wlin": raw["wlin"],                                           # (1, H)
        "blin": raw["blin"].reshape(1, 1),
    }


def ref_params(raw):
    """Unpadded, unscaled, transposed params for the pure-JAX reference."""
    H = raw["whh1"].shape[1]
    return {
        "wih1": raw["wih1"].T, "whh1": raw["whh1"].T,
        "b1": (raw["bih1"] + raw["bhh1"]).reshape(1, 4 * H),
        "wih2": raw["wih2"].T, "whh2": raw["whh2"].T,
        "b2": (raw["bih2"] + raw["bhh2"]).reshape(1, 4 * H),
        "wlin": raw["wlin"].T, "blin": raw["blin"].reshape(1, 1),
    }


def reference_forward(x, p):
    """Pure-JAX reference (same math, jax.nn.sigmoid) for a correctness check."""
    B, T, D = x.shape
    H = p["whh1"].shape[0]

    def cell(x_t, h, c, w_ih, w_hh, b):
        g = x_t @ w_ih + h @ w_hh + b
        i = jax.nn.sigmoid(g[:, 0:H])
        f = jax.nn.sigmoid(g[:, H:2 * H])
        gg = jnp.tanh(g[:, 2 * H:3 * H])
        o = jax.nn.sigmoid(g[:, 3 * H:4 * H])
        c = f * c + i * gg
        return o * jnp.tanh(c), c

    h1 = c1 = h2 = c2 = jnp.zeros((B, H), jnp.float32)
    for t in range(T):
        h1, c1 = cell(x[:, t, :], h1, c1, p["wih1"], p["whh1"], p["b1"])
        h2, c2 = cell(h1, h2, c2, p["wih2"], p["whh2"], p["b2"])
    return h2 @ p["wlin"] + p["blin"]


if __name__ == "__main__":
    # NOTE: the PyTorch 'lstm_out.squeeze()[:, -1, :]' semantics only hold for B > 1;
    # this kernel always implements the B > 1 path and returns (B, 1).
    batch, seq_len, input_dim, hidden_dim = 8, 8, 8, 32

    key = jax.random.PRNGKey(0)
    k_x, k_p = jax.random.split(key)
    x = jax.random.normal(k_x, (batch, seq_len, input_dim), jnp.float32)
    raw = init_params(k_p, input_dim, hidden_dim)
    kparams = pack_kernel_params(raw)

    y = lstm_net_forward(x, kparams)
    y = jax.block_until_ready(y)

    y_ref = reference_forward(x, ref_params(raw))
    assert y.shape == (batch, 1)
    # jnp.dot on TPU defaults to bf16 1-pass precision and the kernel uses the
    # tanh-formulated sigmoid; drift across the 8-step recurrence is ~1e-6, so 1e-4 is
    # comfortable. Use precision=HIGHEST if bit-closer parity is ever required.
    assert jnp.allclose(y, y_ref, atol=1e-4, rtol=1e-4), "mismatch vs reference"

    print("KERNEL_OK")
</pallas_src>

<mosaic_0001>
module attributes {stable_mosaic.version = 11 : i64} {
  func.func @lstm_net_kernel(%arg0: memref<64x8xf32, #tpu.memory_space<vmem>>, %arg1: memref<8x128xf32, #tpu.memory_space<vmem>>, %arg2: memref<32x128xf32, #tpu.memory_space<vmem>>, %arg3: memref<1x128xf32, #tpu.memory_space<vmem>>, %arg4: memref<32x128xf32, #tpu.memory_space<vmem>>, %arg5: memref<32x128xf32, #tpu.memory_space<vmem>>, %arg6: memref<1x128xf32, #tpu.memory_space<vmem>>, %arg7: memref<1x32xf32, #tpu.memory_space<vmem>>, %arg8: memref<1x1xf32, #tpu.memory_space<vmem>>, %arg9: memref<8x1xf32, #tpu.memory_space<vmem>>, %arg10: memref<64x128xf32, #tpu.memory_space<vmem>>) attributes {dimension_semantics = [], scalar_prefetch = 0 : i64, scratch_operands = 1 : i64, tpu.core_type = #tpu.core_type<tc>} {
    %c0 = arith.constant 0 : index
    %c0_0 = arith.constant 0 : index
    %0 = vector.load %arg2[%c0, %c0_0] : memref<32x128xf32, #tpu.memory_space<vmem>>, vector<32x128xf32>
    %c0_1 = arith.constant 0 : index
    %c0_2 = arith.constant 0 : index
    %1 = vector.load %arg4[%c0_1, %c0_2] : memref<32x128xf32, #tpu.memory_space<vmem>>, vector<32x128xf32>
    %c0_3 = arith.constant 0 : index
    %c0_4 = arith.constant 0 : index
    %2 = vector.load %arg5[%c0_3, %c0_4] : memref<32x128xf32, #tpu.memory_space<vmem>>, vector<32x128xf32>
    %c0_5 = arith.constant 0 : index
    %c0_6 = arith.constant 0 : index
    %3 = vector.load %arg6[%c0_5, %c0_6] : memref<1x128xf32, #tpu.memory_space<vmem>>, vector<1x128xf32>
    %c0_7 = arith.constant 0 : index
    %c0_8 = arith.constant 0 : index
    %4 = vector.load %arg0[%c0_7, %c0_8] : memref<64x8xf32, #tpu.memory_space<vmem>>, vector<64x8xf32>
    %c0_9 = arith.constant 0 : index
    %c0_10 = arith.constant 0 : index
    %5 = vector.load %arg1[%c0_9, %c0_10] : memref<8x128xf32, #tpu.memory_space<vmem>>, vector<8x128xf32>
    %cst = arith.constant dense<0.000000e+00> : vector<64x128xf32>
    %6 = tpu.matmul %4, %5, %cst {dimension_numbers = #tpu.dot_dimension_numbers<[1], [0], [0], [1], [0, 0, 1, 1], [], []>} : vector<64x8xf32>, vector<8x128xf32>, vector<64x128xf32> -> vector<64x128xf32>
    %c0_11 = arith.constant 0 : index
    %c0_12 = arith.constant 0 : index
    %7 = vector.load %arg3[%c0_11, %c0_12] : memref<1x128xf32, #tpu.memory_space<vmem>>, vector<1x128xf32>
    %8 = vector.broadcast %7 : vector<1x128xf32> to vector<64x128xf32>
    %9 = arith.addf %6, %8 : vector<64x128xf32>
    %c0_13 = arith.constant 0 : index
    %c0_14 = arith.constant 0 : index
    %10 = vector.load %arg10[%c0_13, %c0_14] : memref<64x128xf32, #tpu.memory_space<vmem>>, vector<64x128xf32>
    tpu.vector_store %arg10[%c0_13, %c0_14], %9 {strides = array<i32>} : memref<64x128xf32, #tpu.memory_space<vmem>>, vector<64x128xf32>,
    %c0_15 = arith.constant 0 : index
    %c0_16 = arith.constant 0 : index
    %11 = vector.load %arg10[%c0_15, %c0_16] : memref<64x128xf32, #tpu.memory_space<vmem>>, vector<8x128xf32>
    %12 = math.tanh %11 : vector<8x128xf32>
    %13 = vector.extract_strided_slice %12 {offsets = [0, 0], sizes = [8, 32], strides = [1, 1]} : vector<8x128xf32> to vector<8x32xf32>
    %cst_17 = arith.constant 5.000000e-01 : f32
    %14 = vector.broadcast %cst_17 : f32 to vector<8x32xf32>
    %15 = arith.mulf %14, %13 : vector<8x32xf32>
    %cst_18 = arith.constant 5.000000e-01 : f32
    %16 = vector.broadcast %cst_18 : f32 to vector<8x32xf32>
    %17 = arith.addf %15, %16 : vector<8x32xf32>
    %18 = vector.extract_strided_slice %12 {offsets = [0, 64], sizes = [8, 32], strides = [1, 1]} : vector<8x128xf32> to vector<8x32xf32>
    %19 = vector.extract_strided_slice %12 {offsets = [0, 96], sizes = [8, 32], strides = [1, 1]} : vector<8x128xf32> to vector<8x32xf32>
    %cst_19 = arith.constant 5.000000e-01 : f32
    %20 = vector.broadcast %cst_19 : f32 to vector<8x32xf32>
    %21 = arith.mulf %20, %19 : vector<8x32xf32>
    %cst_20 = arith.constant 5.000000e-01 : f32
    %22 = vector.broadcast %cst_20 : f32 to vector<8x32xf32>
    %23 = arith.addf %21, %22 : vector<8x32xf32>
    %24 = arith.mulf %17, %18 : vector<8x32xf32>
    %25 = math.tanh %24 : vector<8x32xf32>
    %26 = arith.mulf %23, %25 : vector<8x32xf32>
    %cst_21 = arith.constant dense<0.000000e+00> : vector<8x128xf32>
    %27 = tpu.matmul %26, %1, %cst_21 {dimension_numbers = #tpu.dot_dimension_numbers<[1], [0], [0], [1], [0, 0, 1, 1], [], []>} : vector<8x32xf32>, vector<32x128xf32>, vector<8x128xf32> -> vector<8x128xf32>
    %28 = vector.broadcast %3 : vector<1x128xf32> to vector<8x128xf32>
    %29 = arith.addf %27, %28 : vector<8x128xf32>
    %30 = math.tanh %29 : vector<8x128xf32>
    %31 = vector.extract_strided_slice %30 {offsets = [0, 0], sizes = [8, 32], strides = [1, 1]} : vector<8x128xf32> to vector<8x32xf32>
    %cst_22 = arith.constant 5.000000e-01 : f32
    %32 = vector.broadcast %cst_22 : f32 to vector<8x32xf32>
    %33 = arith.mulf %32, %31 : vector<8x32xf32>
    %cst_23 = arith.constant 5.000000e-01 : f32
    %34 = vector.broadcast %cst_23 : f32 to vector<8x32xf32>
    %35 = arith.addf %33, %34 : vector<8x32xf32>
    %36 = vector.extract_strided_slice %30 {offsets = [0, 64], sizes = [8, 32], strides = [1, 1]} : vector<8x128xf32> to vector<8x32xf32>
    %37 = vector.extract_strided_slice %30 {offsets = [0, 96], sizes = [8, 32], strides = [1, 1]} : vector<8x128xf32> to vector<8x32xf32>
    %cst_24 = arith.constant 5.000000e-01 : f32
    %38 = vector.broadcast %cst_24 : f32 to vector<8x32xf32>
    %39 = arith.mulf %38, %37 : vector<8x32xf32>
    %cst_25 = arith.constant 5.000000e-01 : f32
    %40 = vector.broadcast %cst_25 : f32 to vector<8x32xf32>
    %41 = arith.addf %39, %40 : vector<8x32xf32>
    %42 = arith.mulf %35, %36 : vector<8x32xf32>
    %43 = math.tanh %42 : vector<8x32xf32>
    %44 = arith.mulf %41, %43 : vector<8x32xf32>
    %c1_i32 = arith.constant 1 : i32
    %c8_i32 = arith.constant 8 : i32
    %45 = arith.muli %c1_i32, %c8_i32 : i32
    %46 = tpu.assume_multiple %45, 8 : i32
    %47 = arith.index_cast %46 : i32 to index
    %c0_26 = arith.constant 0 : index
    %48 = vector.load %arg10[%47, %c0_26] : memref<64x128xf32, #tpu.memory_space<vmem>>, vector<8x128xf32>
    %cst_27 = arith.constant dense<0.000000e+00> : vector<8x128xf32>
    %49 = tpu.matmul %26, %0, %cst_27 {dimension_numbers = #tpu.dot_dimension_numbers<[1], [0], [0], [1], [0, 0, 1, 1], [], []>} : vector<8x32xf32>, vector<32x128xf32>, vector<8x128xf32> -> vector<8x128xf32>
    %50 = arith.addf %48, %49 : vector<8x128xf32>
    %51 = math.tanh %50 : vector<8x128xf32>
    %52 = vector.extract_strided_slice %51 {offsets = [0, 0], sizes = [8, 32], strides = [1, 1]} : vector<8x128xf32> to vector<8x32xf32>
    %cst_28 = arith.constant 5.000000e-01 : f32
    %53 = vector.broadcast %cst_28 : f32 to vector<8x32xf32>
    %54 = arith.mulf %53, %52 : vector<8x32xf32>
    %cst_29 = arith.constant 5.000000e-01 : f32
    %55 = vector.broadcast %cst_29 : f32 to vector<8x32xf32>
    %56 = arith.addf %54, %55 : vector<8x32xf32>
    %57 = vector.extract_strided_slice %51 {offsets = [0, 32], sizes = [8, 32], strides = [1, 1]} : vector<8x128xf32> to vector<8x32xf32>
    %cst_30 = arith.constant 5.000000e-01 : f32
    %58 = vector.broadcast %cst_30 : f32 to vector<8x32xf32>
    %59 = arith.mulf %58, %57 : vector<8x32xf32>
    %cst_31 = arith.constant 5.000000e-01 : f32
    %60 = vector.broadcast %cst_31 : f32 to vector<8x32xf32>
    %61 = arith.addf %59, %60 : vector<8x32xf32>
    %62 = vector.extract_strided_slice %51 {offsets = [0, 64], sizes = [8, 32], strides = [1, 1]} : vector<8x128xf32> to vector<8x32xf32>
    %63 = vector.extract_strided_slice %51 {offsets = [0, 96], sizes = [8, 32], strides = [1, 1]} : vector<8x128xf32> to vector<8x32xf32>
    %cst_32 = arith.constant 5.000000e-01 : f32
    %64 = vector.broadcast %cst_32 : f32 to vector<8x32xf32>
    %65 = arith.mulf %64, %63 : vector<8x32xf32>
    %cst_33 = arith.constant 5.000000e-01 : f32
    %66 = vector.broadcast %cst_33 : f32 to vector<8x32xf32>
    %67 = arith.addf %65, %66 : vector<8x32xf32>
    %68 = arith.mulf %61, %24 : vector<8x32xf32>
    %69 = arith.mulf %56, %62 : vector<8x32xf32>
    %70 = arith.addf %68, %69 : vector<8x32xf32>
    %71 = math.tanh %70 : vector<8x32xf32>
    %72 = arith.mulf %67, %71 : vector<8x32xf32>
    %cst_34 = arith.constant dense<0.000000e+00> : vector<8x128xf32>
    %73 = tpu.matmul %72, %1, %cst_34 {dimension_numbers = #tpu.dot_dimension_numbers<[1], [0], [0], [1], [0, 0, 1, 1], [], []>} : vector<8x32xf32>, vector<32x128xf32>, vector<8x128xf32> -> vector<8x128xf32>
    %cst_35 = arith.constant dense<0.000000e+00> : vector<8x128xf32>
    %74 = tpu.matmul %44, %2, %cst_35 {dimension_numbers = #tpu.dot_dimension_numbers<[1], [0], [0], [1], [0, 0, 1, 1], [], []>} : vector<8x32xf32>, vector<32x128xf32>, vector<8x128xf32> -> vector<8x128xf32>
    %75 = arith.addf %73, %74 : vector<8x128xf32>
    %76 = vector.broadcast %3 : vector<1x128xf32> to vector<8x128xf32>
    %77 = arith.addf %75, %76 : vector<8x128xf32>
    %78 = math.tanh %77 : vector<8x128xf32>
    %79 = vector.extract_strided_slice %78 {offsets = [0, 0], sizes = [8, 32], strides = [1, 1]} : vector<8x128xf32> to vector<8x32xf32>
    %cst_36 = arith.constant 5.000000e-01 : f32
    %80 = vector.broadcast %cst_36 : f32 to vector<8x32xf32>
    %81 = arith.mulf %80, %79 : vector<8x32xf32>
    %cst_37 = arith.constant 5.000000e-01 : f32
    %82 = vector.broadcast %cst_37 : f32 to vector<8x32xf32>
    %83 = arith.addf %81, %82 : vector<8x32xf32>
    %84 = vector.extract_strided_slice %78 {offsets = [0, 32], sizes = [8, 32], strides = [1, 1]} : vector<8x128xf32> to vector<8x32xf32>
    %cst_38 = arith.constant 5.000000e-01 : f32
    %85 = vector.broadcast %cst_38 : f32 to vector<8x32xf32>
    %86 = arith.mulf %85, %84 : vector<8x32xf32>
    %cst_39 = arith.constant 5.000000e-01 : f32
    %87 = vector.broadcast %cst_39 : f32 to vector<8x32xf32>
    %88 = arith.addf %86, %87 : vector<8x32xf32>
    %89 = vector.extract_strided_slice %78 {offsets = [0, 64], sizes = [8, 32], strides = [1, 1]} : vector<8x128xf32> to vector<8x32xf32>
    %90 = vector.extract_strided_slice %78 {offsets = [0, 96], sizes = [8, 32], strides = [1, 1]} : vector<8x128xf32> to vector<8x32xf32>
    %cst_40 = arith.constant 5.000000e-01 : f32
    %91 = vector.broadcast %cst_40 : f32 to vector<8x32xf32>
    %92 = arith.mulf %91, %90 : vector<8x32xf32>
    %cst_41 = arith.constant 5.000000e-01 : f32
    %93 = vector.broadcast %cst_41 : f32 to vector<8x32xf32>
    %94 = arith.addf %92, %93 : vector<8x32xf32>
    %95 = arith.mulf %88, %42 : vector<8x32xf32>
    %96 = arith.mulf %83, %89 : vector<8x32xf32>
    %97 = arith.addf %95, %96 : vector<8x32xf32>
    %98 = math.tanh %97 : vector<8x32xf32>
    %99 = arith.mulf %94, %98 : vector<8x32xf32>
    %c2_i32 = arith.constant 2 : i32
    %c8_i32_42 = arith.constant 8 : i32
    %100 = arith.muli %c2_i32, %c8_i32_42 : i32
    %101 = tpu.assume_multiple %100, 8 : i32
    %102 = arith.index_cast %101 : i32 to index
    %c0_43 = arith.constant 0 : index
    %103 = vector.load %arg10[%102, %c0_43] : memref<64x128xf32, #tpu.memory_space<vmem>>, vector<8x128xf32>
    %cst_44 = arith.constant dense<0.000000e+00> : vector<8x128xf32>
    %104 = tpu.matmul %72, %0, %cst_44 {dimension_numbers = #tpu.dot_dimension_numbers<[1], [0], [0], [1], [0, 0, 1, 1], [], []>} : vector<8x32xf32>, vector<32x128xf32>, vector<8x128xf32> -> vector<8x128xf32>
    %105 = arith.addf %103, %104 : vector<8x128xf32>
    %106 = math.tanh %105 : vector<8x128xf32>
    %107 = vector.extract_strided_slice %106 {offsets = [0, 0], sizes = [8, 32], strides = [1, 1]} : vector<8x128xf32> to vector<8x32xf32>
    %cst_45 = arith.constant 5.000000e-01 : f32
    %108 = vector.broadcast %cst_45 : f32 to vector<8x32xf32>
    %109 = arith.mulf %108, %107 : vector<8x32xf32>
    %cst_46 = arith.constant 5.000000e-01 : f32
    %110 = vector.broadcast %cst_46 : f32 to vector<8x32xf32>
    %111 = arith.addf %109, %110 : vector<8x32xf32>
    %112 = vector.extract_strided_slice %106 {offsets = [0, 32], sizes = [8, 32], strides = [1, 1]} : vector<8x128xf32> to vector<8x32xf32>
    %cst_47 = arith.constant 5.000000e-01 : f32
    %113 = vector.broadcast %cst_47 : f32 to vector<8x32xf32>
    %114 = arith.mulf %113, %112 : vector<8x32xf32>
    %cst_48 = arith.constant 5.000000e-01 : f32
    %115 = vector.broadcast %cst_48 : f32 to vector<8x32xf32>
    %116 = arith.addf %114, %115 : vector<8x32xf32>
    %117 = vector.extract_strided_slice %106 {offsets = [0, 64], sizes = [8, 32], strides = [1, 1]} : vector<8x128xf32> to vector<8x32xf32>
    %118 = vector.extract_strided_slice %106 {offsets = [0, 96], sizes = [8, 32], strides = [1, 1]} : vector<8x128xf32> to vector<8x32xf32>
    %cst_49 = arith.constant 5.000000e-01 : f32
    %119 = vector.broadcast %cst_49 : f32 to vector<8x32xf32>
    %120 = arith.mulf %119, %118 : vector<8x32xf32>
    %cst_50 = arith.constant 5.000000e-01 : f32
    %121 = vector.broadcast %cst_50 : f32 to vector<8x32xf32>
    %122 = arith.addf %120, %121 : vector<8x32xf32>
    %123 = arith.mulf %116, %70 : vector<8x32xf32>
    %124 = arith.mulf %111, %117 : vector<8x32xf32>
    %125 = arith.addf %123, %124 : vector<8x32xf32>
    %126 = math.tanh %125 : vector<8x32xf32>
    %127 = arith.mulf %122, %126 : vector<8x32xf32>
    %cst_51 = arith.constant dense<0.000000e+00> : vector<8x128xf32>
    %128 = tpu.matmul %127, %1, %cst_51 {dimension_numbers = #tpu.dot_dimension_numbers<[1], [0], [0], [1], [0, 0, 1, 1], [], []>} : vector<8x32xf32>, vector<32x128xf32>, vector<8x128xf32> -> vector<8x128xf32>
    %cst_52 = arith.constant dense<0.000000e+00> : vector<8x128xf32>
    %129 = tpu.matmul %99, %2, %cst_52 {dimension_numbers = #tpu.dot_dimension_numbers<[1], [0], [0], [1], [0, 0, 1, 1], [], []>} : vector<8x32xf32>, vector<32x128xf32>, vector<8x128xf32> -> vector<8x128xf32>
    %130 = arith.addf %128, %129 : vector<8x128xf32>
    %131 = vector.broadcast %3 : vector<1x128xf32> to vector<8x128xf32>
    %132 = arith.addf %130, %131 : vector<8x128xf32>
    %133 = math.tanh %132 : vector<8x128xf32>
    %134 = vector.extract_strided_slice %133 {offsets = [0, 0], sizes = [8, 32], strides = [1, 1]} : vector<8x128xf32> to vector<8x32xf32>
    %cst_53 = arith.constant 5.000000e-01 : f32
    %135 = vector.broadcast %cst_53 : f32 to vector<8x32xf32>
    %136 = arith.mulf %135, %134 : vector<8x32xf32>
    %cst_54 = arith.constant 5.000000e-01 : f32
    %137 = vector.broadcast %cst_54 : f32 to vector<8x32xf32>
    %138 = arith.addf %136, %137 : vector<8x32xf32>
    %139 = vector.extract_strided_slice %133 {offsets = [0, 32], sizes = [8, 32], strides = [1, 1]} : vector<8x128xf32> to vector<8x32xf32>
    %cst_55 = arith.constant 5.000000e-01 : f32
    %140 = vector.broadcast %cst_55 : f32 to vector<8x32xf32>
    %141 = arith.mulf %140, %139 : vector<8x32xf32>
    %cst_56 = arith.constant 5.000000e-01 : f32
    %142 = vector.broadcast %cst_56 : f32 to vector<8x32xf32>
    %143 = arith.addf %141, %142 : vector<8x32xf32>
    %144 = vector.extract_strided_slice %133 {offsets = [0, 64], sizes = [8, 32], strides = [1, 1]} : vector<8x128xf32> to vector<8x32xf32>
    %145 = vector.extract_strided_slice %133 {offsets = [0, 96], sizes = [8, 32], strides = [1, 1]} : vector<8x128xf32> to vector<8x32xf32>
    %cst_57 = arith.constant 5.000000e-01 : f32
    %146 = vector.broadcast %cst_57 : f32 to vector<8x32xf32>
    %147 = arith.mulf %146, %145 : vector<8x32xf32>
    %cst_58 = arith.constant 5.000000e-01 : f32
    %148 = vector.broadcast %cst_58 : f32 to vector<8x32xf32>
    %149 = arith.addf %147, %148 : vector<8x32xf32>
    %150 = arith.mulf %143, %97 : vector<8x32xf32>
    %151 = arith.mulf %138, %144 : vector<8x32xf32>
    %152 = arith.addf %150, %151 : vector<8x32xf32>
    %153 = math.tanh %152 : vector<8x32xf32>
    %154 = arith.mulf %149, %153 : vector<8x32xf32>
    %c3_i32 = arith.constant 3 : i32
    %c8_i32_59 = arith.constant 8 : i32
    %155 = arith.muli %c3_i32, %c8_i32_59 : i32
    %156 = tpu.assume_multiple %155, 8 : i32
    %157 = arith.index_cast %156 : i32 to index
    %c0_60 = arith.constant 0 : index
    %158 = vector.load %arg10[%157, %c0_60] : memref<64x128xf32, #tpu.memory_space<vmem>>, vector<8x128xf32>
    %cst_61 = arith.constant dense<0.000000e+00> : vector<8x128xf32>
    %159 = tpu.matmul %127, %0, %cst_61 {dimension_numbers = #tpu.dot_dimension_numbers<[1], [0], [0], [1], [0, 0, 1, 1], [], []>} : vector<8x32xf32>, vector<32x128xf32>, vector<8x128xf32> -> vector<8x128xf32>
    %160 = arith.addf %158, %159 : vector<8x128xf32>
    %161 = math.tanh %160 : vector<8x128xf32>
    %162 = vector.extract_strided_slice %161 {offsets = [0, 0], sizes = [8, 32], strides = [1, 1]} : vector<8x128xf32> to vector<8x32xf32>
    %cst_62 = arith.constant 5.000000e-01 : f32
    %163 = vector.broadcast %cst_62 : f32 to vector<8x32xf32>
    %164 = arith.mulf %163, %162 : vector<8x32xf32>
    %cst_63 = arith.constant 5.000000e-01 : f32
    %165 = vector.broadcast %cst_63 : f32 to vector<8x32xf32>
    %166 = arith.addf %164, %165 : vector<8x32xf32>
    %167 = vector.extract_strided_slice %161 {offsets = [0, 32], sizes = [8, 32], strides = [1, 1]} : vector<8x128xf32> to vector<8x32xf32>
    %cst_64 = arith.constant 5.000000e-01 : f32
    %168 = vector.broadcast %cst_64 : f32 to vector<8x32xf32>
    %169 = arith.mulf %168, %167 : vector<8x32xf32>
    %cst_65 = arith.constant 5.000000e-01 : f32
    %170 = vector.broadcast %cst_65 : f32 to vector<8x32xf32>
    %171 = arith.addf %169, %170 : vector<8x32xf32>
    %172 = vector.extract_strided_slice %161 {offsets = [0, 64], sizes = [8, 32], strides = [1, 1]} : vector<8x128xf32> to vector<8x32xf32>
    %173 = vector.extract_strided_slice %161 {offsets = [0, 96], sizes = [8, 32], strides = [1, 1]} : vector<8x128xf32> to vector<8x32xf32>
    %cst_66 = arith.constant 5.000000e-01 : f32
    %174 = vector.broadcast %cst_66 : f32 to vector<8x32xf32>
    %175 = arith.mulf %174, %173 : vector<8x32xf32>
    %cst_67 = arith.constant 5.000000e-01 : f32
    %176 = vector.broadcast %cst_67 : f32 to vector<8x32xf32>
    %177 = arith.addf %175, %176 : vector<8x32xf32>
    %178 = arith.mulf %171, %125 : vector<8x32xf32>
    %179 = arith.mulf %166, %172 : vector<8x32xf32>
    %180 = arith.addf %178, %179 : vector<8x32xf32>
    %181 = math.tanh %180 : vector<8x32xf32>
    %182 = arith.mulf %177, %181 : vector<8x32xf32>
    %cst_68 = arith.constant dense<0.000000e+00> : vector<8x128xf32>
    %183 = tpu.matmul %182, %1, %cst_68 {dimension_numbers = #tpu.dot_dimension_numbers<[1], [0], [0], [1], [0, 0, 1, 1], [], []>} : vector<8x32xf32>, vector<32x128xf32>, vector<8x128xf32> -> vector<8x128xf32>
    %cst_69 = arith.constant dense<0.000000e+00> : vector<8x128xf32>
    %184 = tpu.matmul %154, %2, %cst_69 {dimension_numbers = #tpu.dot_dimension_numbers<[1], [0], [0], [1], [0, 0, 1, 1], [], []>} : vector<8x32xf32>, vector<32x128xf32>, vector<8x128xf32> -> vector<8x128xf32>
    %185 = arith.addf %183, %184 : vector<8x128xf32>
    %186 = vector.broadcast %3 : vector<1x128xf32> to vector<8x128xf32>
    %187 = arith.addf %185, %186 : vector<8x128xf32>
    %188 = math.tanh %187 : vector<8x128xf32>
    %189 = vector.extract_strided_slice %188 {offsets = [0, 0], sizes = [8, 32], strides = [1, 1]} : vector<8x128xf32> to vector<8x32xf32>
    %cst_70 = arith.constant 5.000000e-01 : f32
    %190 = vector.broadcast %cst_70 : f32 to vector<8x32xf32>
    %191 = arith.mulf %190, %189 : vector<8x32xf32>
    %cst_71 = arith.constant 5.000000e-01 : f32
    %192 = vector.broadcast %cst_71 : f32 to vector<8x32xf32>
    %193 = arith.addf %191, %192 : vector<8x32xf32>
    %194 = vector.extract_strided_slice %188 {offsets = [0, 32], sizes = [8, 32], strides = [1, 1]} : vector<8x128xf32> to vector<8x32xf32>
    %cst_72 = arith.constant 5.000000e-01 : f32
    %195 = vector.broadcast %cst_72 : f32 to vector<8x32xf32>
    %196 = arith.mulf %195, %194 : vector<8x32xf32>
    %cst_73 = arith.constant 5.000000e-01 : f32
    %197 = vector.broadcast %cst_73 : f32 to vector<8x32xf32>
    %198 = arith.addf %196, %197 : vector<8x32xf32>
    %199 = vector.extract_strided_slice %188 {offsets = [0, 64], sizes = [8, 32], strides = [1, 1]} : vector<8x128xf32> to vector<8x32xf32>
    %200 = vector.extract_strided_slice %188 {offsets = [0, 96], sizes = [8, 32], strides = [1, 1]} : vector<8x128xf32> to vector<8x32xf32>
    %cst_74 = arith.constant 5.000000e-01 : f32
    %201 = vector.broadcast %cst_74 : f32 to vector<8x32xf32>
    %202 = arith.mulf %201, %200 : vector<8x32xf32>
    %cst_75 = arith.constant 5.000000e-01 : f32
    %203 = vector.broadcast %cst_75 : f32 to vector<8x32xf32>
    %204 = arith.addf %202, %203 : vector<8x32xf32>
    %205 = arith.mulf %198, %152 : vector<8x32xf32>
    %206 = arith.mulf %193, %199 : vector<8x32xf32>
    %207 = arith.addf %205, %206 : vector<8x32xf32>
    %208 = math.tanh %207 : vector<8x32xf32>
    %209 = arith.mulf %204, %208 : vector<8x32xf32>
    %c4_i32 = arith.constant 4 : i32
    %c8_i32_76 = arith.constant 8 : i32
    %210 = arith.muli %c4_i32, %c8_i32_76 : i32
    %211 = tpu.assume_multiple %210, 8 : i32
    %212 = arith.index_cast %211 : i32 to index
    %c0_77 = arith.constant 0 : index
    %213 = vector.load %arg10[%212, %c0_77] : memref<64x128xf32, #tpu.memory_space<vmem>>, vector<8x128xf32>
    %cst_78 = arith.constant dense<0.000000e+00> : vector<8x128xf32>
    %214 = tpu.matmul %182, %0, %cst_78 {dimension_numbers = #tpu.dot_dimension_numbers<[1], [0], [0], [1], [0, 0, 1, 1], [], []>} : vector<8x32xf32>, vector<32x128xf32>, vector<8x128xf32> -> vector<8x128xf32>
    %215 = arith.addf %213, %214 : vector<8x128xf32>
    %216 = math.tanh %215 : vector<8x128xf32>
    %217 = vector.extract_strided_slice %216 {offsets = [0, 0], sizes = [8, 32], strides = [1, 1]} : vector<8x128xf32> to vector<8x32xf32>
    %cst_79 = arith.constant 5.000000e-01 : f32
    %218 = vector.broadcast %cst_79 : f32 to vector<8x32xf32>
    %219 = arith.mulf %218, %217 : vector<8x32xf32>
    %cst_80 = arith.constant 5.000000e-01 : f32
    %220 = vector.broadcast %cst_80 : f32 to vector<8x32xf32>
    %221 = arith.addf %219, %220 : vector<8x32xf32>
    %222 = vector.extract_strided_slice %216 {offsets = [0, 32], sizes = [8, 32], strides = [1, 1]} : vector<8x128xf32> to vector<8x32xf32>
    %cst_81 = arith.constant 5.000000e-01 : f32
    %223 = vector.broadcast %cst_81 : f32 to vector<8x32xf32>
    %224 = arith.mulf %223, %222 : vector<8x32xf32>
    %cst_82 = arith.constant 5.000000e-01 : f32
    %225 = vector.broadcast %cst_82 : f32 to vector<8x32xf32>
    %226 = arith.addf %224, %225 : vector<8x32xf32>
    %227 = vector.extract_strided_slice %216 {offsets = [0, 64], sizes = [8, 32], strides = [1, 1]} : vector<8x128xf32> to vector<8x32xf32>
    %228 = vector.extract_strided_slice %216 {offsets = [0, 96], sizes = [8, 32], strides = [1, 1]} : vector<8x128xf32> to vector<8x32xf32>
    %cst_83 = arith.constant 5.000000e-01 : f32
    %229 = vector.broadcast %cst_83 : f32 to vector<8x32xf32>
    %230 = arith.mulf %229, %228 : vector<8x32xf32>
    %cst_84 = arith.constant 5.000000e-01 : f32
    %231 = vector.broadcast %cst_84 : f32 to vector<8x32xf32>
    %232 = arith.addf %230, %231 : vector<8x32xf32>
    %233 = arith.mulf %226, %180 : vector<8x32xf32>
    %234 = arith.mulf %221, %227 : vector<8x32xf32>
    %235 = arith.addf %233, %234 : vector<8x32xf32>
    %236 = math.tanh %235 : vector<8x32xf32>
    %237 = arith.mulf %232, %236 : vector<8x32xf32>
    %cst_85 = arith.constant dense<0.000000e+00> : vector<8x128xf32>
    %238 = tpu.matmul %237, %1, %cst_85 {dimension_numbers = #tpu.dot_dimension_numbers<[1], [0], [0], [1], [0, 0, 1, 1], [], []>} : vector<8x32xf32>, vector<32x128xf32>, vector<8x128xf32> -> vector<8x128xf32>
    %cst_86 = arith.constant dense<0.000000e+00> : vector<8x128xf32>
    %239 = tpu.matmul %209, %2, %cst_86 {dimension_numbers = #tpu.dot_dimension_numbers<[1], [0], [0], [1], [0, 0, 1, 1], [], []>} : vector<8x32xf32>, vector<32x128xf32>, vector<8x128xf32> -> vector<8x128xf32>
    %240 = arith.addf %238, %239 : vector<8x128xf32>
    %241 = vector.broadcast %3 : vector<1x128xf32> to vector<8x128xf32>
    %242 = arith.addf %240, %241 : vector<8x128xf32>
    %243 = math.tanh %242 : vector<8x128xf32>
    %244 = vector.extract_strided_slice %243 {offsets = [0, 0], sizes = [8, 32], strides = [1, 1]} : vector<8x128xf32> to vector<8x32xf32>
    %cst_87 = arith.constant 5.000000e-01 : f32
    %245 = vector.broadcast %cst_87 : f32 to vector<8x32xf32>
    %246 = arith.mulf %245, %244 : vector<8x32xf32>
    %cst_88 = arith.constant 5.000000e-01 : f32
    %247 = vector.broadcast %cst_88 : f32 to vector<8x32xf32>
    %248 = arith.addf %246, %247 : vector<8x32xf32>
    %249 = vector.extract_strided_slice %243 {offsets = [0, 32], sizes = [8, 32], strides = [1, 1]} : vector<8x128xf32> to vector<8x32xf32>
    %cst_89 = arith.constant 5.000000e-01 : f32
    %250 = vector.broadcast %cst_89 : f32 to vector<8x32xf32>
    %251 = arith.mulf %250, %249 : vector<8x32xf32>
    %cst_90 = arith.constant 5.000000e-01 : f32
    %252 = vector.broadcast %cst_90 : f32 to vector<8x32xf32>
    %253 = arith.addf %251, %252 : vector<8x32xf32>
    %254 = vector.extract_strided_slice %243 {offsets = [0, 64], sizes = [8, 32], strides = [1, 1]} : vector<8x128xf32> to vector<8x32xf32>
    %255 = vector.extract_strided_slice %243 {offsets = [0, 96], sizes = [8, 32], strides = [1, 1]} : vector<8x128xf32> to vector<8x32xf32>
    %cst_91 = arith.constant 5.000000e-01 : f32
    %256 = vector.broadcast %cst_91 : f32 to vector<8x32xf32>
    %257 = arith.mulf %256, %255 : vector<8x32xf32>
    %cst_92 = arith.constant 5.000000e-01 : f32
    %258 = vector.broadcast %cst_92 : f32 to vector<8x32xf32>
    %259 = arith.addf %257, %258 : vector<8x32xf32>
    %260 = arith.mulf %253, %207 : vector<8x32xf32>
    %261 = arith.mulf %248, %254 : vector<8x32xf32>
    %262 = arith.addf %260, %261 : vector<8x32xf32>
    %263 = math.tanh %262 : vector<8x32xf32>
    %264 = arith.mulf %259, %263 : vector<8x32xf32>
    %c5_i32 = arith.constant 5 : i32
    %c8_i32_93 = arith.constant 8 : i32
    %265 = arith.muli %c5_i32, %c8_i32_93 : i32
    %266 = tpu.assume_multiple %265, 8 : i32
    %267 = arith.index_cast %266 : i32 to index
    %c0_94 = arith.constant 0 : index
    %268 = vector.load %arg10[%267, %c0_94] : memref<64x128xf32, #tpu.memory_space<vmem>>, vector<8x128xf32>
    %cst_95 = arith.constant dense<0.000000e+00> : vector<8x128xf32>
    %269 = tpu.matmul %237, %0, %cst_95 {dimension_numbers = #tpu.dot_dimension_numbers<[1], [0], [0], [1], [0, 0, 1, 1], [], []>} : vector<8x32xf32>, vector<32x128xf32>, vector<8x128xf32> -> vector<8x128xf32>
    %270 = arith.addf %268, %269 : vector<8x128xf32>
    %271 = math.tanh %270 : vector<8x128xf32>
    %272 = vector.extract_strided_slice %271 {offsets = [0, 0], sizes = [8, 32], strides = [1, 1]} : vector<8x128xf32> to vector<8x32xf32>
    %cst_96 = arith.constant 5.000000e-01 : f32
    %273 = vector.broadcast %cst_96 : f32 to vector<8x32xf32>
    %274 = arith.mulf %273, %272 : vector<8x32xf32>
    %cst_97 = arith.constant 5.000000e-01 : f32
    %275 = vector.broadcast %cst_97 : f32 to vector<8x32xf32>
    %276 = arith.addf %274, %275 : vector<8x32xf32>
    %277 = vector.extract_strided_slice %271 {offsets = [0, 32], sizes = [8, 32], strides = [1, 1]} : vector<8x128xf32> to vector<8x32xf32>
    %cst_98 = arith.constant 5.000000e-01 : f32
    %278 = vector.broadcast %cst_98 : f32 to vector<8x32xf32>
    %279 = arith.mulf %278, %277 : vector<8x32xf32>
    %cst_99 = arith.constant 5.000000e-01 : f32
    %280 = vector.broadcast %cst_99 : f32 to vector<8x32xf32>
    %281 = arith.addf %279, %280 : vector<8x32xf32>
    %282 = vector.extract_strided_slice %271 {offsets = [0, 64], sizes = [8, 32], strides = [1, 1]} : vector<8x128xf32> to vector<8x32xf32>
    %283 = vector.extract_strided_slice %271 {offsets = [0, 96], sizes = [8, 32], strides = [1, 1]} : vector<8x128xf32> to vector<8x32xf32>
    %cst_100 = arith.constant 5.000000e-01 : f32
    %284 = vector.broadcast %cst_100 : f32 to vector<8x32xf32>
    %285 = arith.mulf %284, %283 : vector<8x32xf32>
    %cst_101 = arith.constant 5.000000e-01 : f32
    %286 = vector.broadcast %cst_101 : f32 to vector<8x32xf32>
    %287 = arith.addf %285, %286 : vector<8x32xf32>
    %288 = arith.mulf %281, %235 : vector<8x32xf32>
    %289 = arith.mulf %276, %282 : vector<8x32xf32>
    %290 = arith.addf %288, %289 : vector<8x32xf32>
    %291 = math.tanh %290 : vector<8x32xf32>
    %292 = arith.mulf %287, %291 : vector<8x32xf32>
    %cst_102 = arith.constant dense<0.000000e+00> : vector<8x128xf32>
    %293 = tpu.matmul %292, %1, %cst_102 {dimension_numbers = #tpu.dot_dimension_numbers<[1], [0], [0], [1], [0, 0, 1, 1], [], []>} : vector<8x32xf32>, vector<32x128xf32>, vector<8x128xf32> -> vector<8x128xf32>
    %cst_103 = arith.constant dense<0.000000e+00> : vector<8x128xf32>
    %294 = tpu.matmul %264, %2, %cst_103 {dimension_numbers = #tpu.dot_dimension_numbers<[1], [0], [0], [1], [0, 0, 1, 1], [], []>} : vector<8x32xf32>, vector<32x128xf32>, vector<8x128xf32> -> vector<8x128xf32>
    %295 = arith.addf %293, %294 : vector<8x128xf32>
    %296 = vector.broadcast %3 : vector<1x128xf32> to vector<8x128xf32>
    %297 = arith.addf %295, %296 : vector<8x128xf32>
    %298 = math.tanh %297 : vector<8x128xf32>
    %299 = vector.extract_strided_slice %298 {offsets = [0, 0], sizes = [8, 32], strides = [1, 1]} : vector<8x128xf32> to vector<8x32xf32>
    %cst_104 = arith.constant 5.000000e-01 : f32
    %300 = vector.broadcast %cst_104 : f32 to vector<8x32xf32>
    %301 = arith.mulf %300, %299 : vector<8x32xf32>
    %cst_105 = arith.constant 5.000000e-01 : f32
    %302 = vector.broadcast %cst_105 : f32 to vector<8x32xf32>
    %303 = arith.addf %301, %302 : vector<8x32xf32>
    %304 = vector.extract_strided_slice %298 {offsets = [0, 32], sizes = [8, 32], strides = [1, 1]} : vector<8x128xf32> to vector<8x32xf32>
    %cst_106 = arith.constant 5.000000e-01 : f32
    %305 = vector.broadcast %cst_106 : f32 to vector<8x32xf32>
    %306 = arith.mulf %305, %304 : vector<8x32xf32>
    %cst_107 = arith.constant 5.000000e-01 : f32
    %307 = vector.broadcast %cst_107 : f32 to vector<8x32xf32>
    %308 = arith.addf %306, %307 : vector<8x32xf32>
    %309 = vector.extract_strided_slice %298 {offsets = [0, 64], sizes = [8, 32], strides = [1, 1]} : vector<8x128xf32> to vector<8x32xf32>
    %310 = vector.extract_strided_slice %298 {offsets = [0, 96], sizes = [8, 32], strides = [1, 1]} : vector<8x128xf32> to vector<8x32xf32>
    %cst_108 = arith.constant 5.000000e-01 : f32
    %311 = vector.broadcast %cst_108 : f32 to vector<8x32xf32>
    %312 = arith.mulf %311, %310 : vector<8x32xf32>
    %cst_109 = arith.constant 5.000000e-01 : f32
    %313 = vector.broadcast %cst_109 : f32 to vector<8x32xf32>
    %314 = arith.addf %312, %313 : vector<8x32xf32>
    %315 = arith.mulf %308, %262 : vector<8x32xf32>
    %316 = arith.mulf %303, %309 : vector<8x32xf32>
    %317 = arith.addf %315, %316 : vector<8x32xf32>
    %318 = math.tanh %317 : vector<8x32xf32>
    %319 = arith.mulf %314, %318 : vector<8x32xf32>
    %c6_i32 = arith.constant 6 : i32
    %c8_i32_110 = arith.constant 8 : i32
    %320 = arith.muli %c6_i32, %c8_i32_110 : i32
    %321 = tpu.assume_multiple %320, 8 : i32
    %322 = arith.index_cast %321 : i32 to index
    %c0_111 = arith.constant 0 : index
    %323 = vector.load %arg10[%322, %c0_111] : memref<64x128xf32, #tpu.memory_space<vmem>>, vector<8x128xf32>
    %cst_112 = arith.constant dense<0.000000e+00> : vector<8x128xf32>
    %324 = tpu.matmul %292, %0, %cst_112 {dimension_numbers = #tpu.dot_dimension_numbers<[1], [0], [0], [1], [0, 0, 1, 1], [], []>} : vector<8x32xf32>, vector<32x128xf32>, vector<8x128xf32> -> vector<8x128xf32>
    %325 = arith.addf %323, %324 : vector<8x128xf32>
    %326 = math.tanh %325 : vector<8x128xf32>
    %327 = vector.extract_strided_slice %326 {offsets = [0, 0], sizes = [8, 32], strides = [1, 1]} : vector<8x128xf32> to vector<8x32xf32>
    %cst_113 = arith.constant 5.000000e-01 : f32
    %328 = vector.broadcast %cst_113 : f32 to vector<8x32xf32>
    %329 = arith.mulf %328, %327 : vector<8x32xf32>
    %cst_114 = arith.constant 5.000000e-01 : f32
    %330 = vector.broadcast %cst_114 : f32 to vector<8x32xf32>
    %331 = arith.addf %329, %330 : vector<8x32xf32>
    %332 = vector.extract_strided_slice %326 {offsets = [0, 32], sizes = [8, 32], strides = [1, 1]} : vector<8x128xf32> to vector<8x32xf32>
    %cst_115 = arith.constant 5.000000e-01 : f32
    %333 = vector.broadcast %cst_115 : f32 to vector<8x32xf32>
    %334 = arith.mulf %333, %332 : vector<8x32xf32>
    %cst_116 = arith.constant 5.000000e-01 : f32
    %335 = vector.broadcast %cst_116 : f32 to vector<8x32xf32>
    %336 = arith.addf %334, %335 : vector<8x32xf32>
    %337 = vector.extract_strided_slice %326 {offsets = [0, 64], sizes = [8, 32], strides = [1, 1]} : vector<8x128xf32> to vector<8x32xf32>
    %338 = vector.extract_strided_slice %326 {offsets = [0, 96], sizes = [8, 32], strides = [1, 1]} : vector<8x128xf32> to vector<8x32xf32>
    %cst_117 = arith.constant 5.000000e-01 : f32
    %339 = vector.broadcast %cst_117 : f32 to vector<8x32xf32>
    %340 = arith.mulf %339, %338 : vector<8x32xf32>
    %cst_118 = arith.constant 5.000000e-01 : f32
    %341 = vector.broadcast %cst_118 : f32 to vector<8x32xf32>
    %342 = arith.addf %340, %341 : vector<8x32xf32>
    %343 = arith.mulf %336, %290 : vector<8x32xf32>
    %344 = arith.mulf %331, %337 : vector<8x32xf32>
    %345 = arith.addf %343, %344 : vector<8x32xf32>
    %346 = math.tanh %345 : vector<8x32xf32>
    %347 = arith.mulf %342, %346 : vector<8x32xf32>
    %cst_119 = arith.constant dense<0.000000e+00> : vector<8x128xf32>
    %348 = tpu.matmul %347, %1, %cst_119 {dimension_numbers = #tpu.dot_dimension_numbers<[1], [0], [0], [1], [0, 0, 1, 1], [], []>} : vector<8x32xf32>, vector<32x128xf32>, vector<8x128xf32> -> vector<8x128xf32>
    %cst_120 = arith.constant dense<0.000000e+00> : vector<8x128xf32>
    %349 = tpu.matmul %319, %2, %cst_120 {dimension_numbers = #tpu.dot_dimension_numbers<[1], [0], [0], [1], [0, 0, 1, 1], [], []>} : vector<8x32xf32>, vector<32x128xf32>, vector<8x128xf32> -> vector<8x128xf32>
    %350 = arith.addf %348, %349 : vector<8x128xf32>
    %351 = vector.broadcast %3 : vector<1x128xf32> to vector<8x128xf32>
    %352 = arith.addf %350, %351 : vector<8x128xf32>
    %353 = math.tanh %352 : vector<8x128xf32>
    %354 = vector.extract_strided_slice %353 {offsets = [0, 0], sizes = [8, 32], strides = [1, 1]} : vector<8x128xf32> to vector<8x32xf32>
    %cst_121 = arith.constant 5.000000e-01 : f32
    %355 = vector.broadcast %cst_121 : f32 to vector<8x32xf32>
    %356 = arith.mulf %355, %354 : vector<8x32xf32>
    %cst_122 = arith.constant 5.000000e-01 : f32
    %357 = vector.broadcast %cst_122 : f32 to vector<8x32xf32>
    %358 = arith.addf %356, %357 : vector<8x32xf32>
    %359 = vector.extract_strided_slice %353 {offsets = [0, 32], sizes = [8, 32], strides = [1, 1]} : vector<8x128xf32> to vector<8x32xf32>
    %cst_123 = arith.constant 5.000000e-01 : f32
    %360 = vector.broadcast %cst_123 : f32 to vector<8x32xf32>
    %361 = arith.mulf %360, %359 : vector<8x32xf32>
    %cst_124 = arith.constant 5.000000e-01 : f32
    %362 = vector.broadcast %cst_124 : f32 to vector<8x32xf32>
    %363 = arith.addf %361, %362 : vector<8x32xf32>
    %364 = vector.extract_strided_slice %353 {offsets = [0, 64], sizes = [8, 32], strides = [1, 1]} : vector<8x128xf32> to vector<8x32xf32>
    %365 = vector.extract_strided_slice %353 {offsets = [0, 96], sizes = [8, 32], strides = [1, 1]} : vector<8x128xf32> to vector<8x32xf32>
    %cst_125 = arith.constant 5.000000e-01 : f32
    %366 = vector.broadcast %cst_125 : f32 to vector<8x32xf32>
    %367 = arith.mulf %366, %365 : vector<8x32xf32>
    %cst_126 = arith.constant 5.000000e-01 : f32
    %368 = vector.broadcast %cst_126 : f32 to vector<8x32xf32>
    %369 = arith.addf %367, %368 : vector<8x32xf32>
    %370 = arith.mulf %363, %317 : vector<8x32xf32>
    %371 = arith.mulf %358, %364 : vector<8x32xf32>
    %372 = arith.addf %370, %371 : vector<8x32xf32>
    %373 = math.tanh %372 : vector<8x32xf32>
    %374 = arith.mulf %369, %373 : vector<8x32xf32>
    %c7_i32 = arith.constant 7 : i32
    %c8_i32_127 = arith.constant 8 : i32
    %375 = arith.muli %c7_i32, %c8_i32_127 : i32
    %376 = tpu.assume_multiple %375, 8 : i32
    %377 = arith.index_cast %376 : i32 to index
    %c0_128 = arith.constant 0 : index
    %378 = vector.load %arg10[%377, %c0_128] : memref<64x128xf32, #tpu.memory_space<vmem>>, vector<8x128xf32>
    %cst_129 = arith.constant dense<0.000000e+00> : vector<8x128xf32>
    %379 = tpu.matmul %347, %0, %cst_129 {dimension_numbers = #tpu.dot_dimension_numbers<[1], [0], [0], [1], [0, 0, 1, 1], [], []>} : vector<8x32xf32>, vector<32x128xf32>, vector<8x128xf32> -> vector<8x128xf32>
    %380 = arith.addf %378, %379 : vector<8x128xf32>
    %381 = math.tanh %380 : vector<8x128xf32>
    %382 = vector.extract_strided_slice %381 {offsets = [0, 0], sizes = [8, 32], strides = [1, 1]} : vector<8x128xf32> to vector<8x32xf32>
    %cst_130 = arith.constant 5.000000e-01 : f32
    %383 = vector.broadcast %cst_130 : f32 to vector<8x32xf32>
    %384 = arith.mulf %383, %382 : vector<8x32xf32>
    %cst_131 = arith.constant 5.000000e-01 : f32
    %385 = vector.broadcast %cst_131 : f32 to vector<8x32xf32>
    %386 = arith.addf %384, %385 : vector<8x32xf32>
    %387 = vector.extract_strided_slice %381 {offsets = [0, 32], sizes = [8, 32], strides = [1, 1]} : vector<8x128xf32> to vector<8x32xf32>
    %cst_132 = arith.constant 5.000000e-01 : f32
    %388 = vector.broadcast %cst_132 : f32 to vector<8x32xf32>
    %389 = arith.mulf %388, %387 : vector<8x32xf32>
    %cst_133 = arith.constant 5.000000e-01 : f32
    %390 = vector.broadcast %cst_133 : f32 to vector<8x32xf32>
    %391 = arith.addf %389, %390 : vector<8x32xf32>
    %392 = vector.extract_strided_slice %381 {offsets = [0, 64], sizes = [8, 32], strides = [1, 1]} : vector<8x128xf32> to vector<8x32xf32>
    %393 = vector.extract_strided_slice %381 {offsets = [0, 96], sizes = [8, 32], strides = [1, 1]} : vector<8x128xf32> to vector<8x32xf32>
    %cst_134 = arith.constant 5.000000e-01 : f32
    %394 = vector.broadcast %cst_134 : f32 to vector<8x32xf32>
    %395 = arith.mulf %394, %393 : vector<8x32xf32>
    %cst_135 = arith.constant 5.000000e-01 : f32
    %396 = vector.broadcast %cst_135 : f32 to vector<8x32xf32>
    %397 = arith.addf %395, %396 : vector<8x32xf32>
    %398 = arith.mulf %391, %345 : vector<8x32xf32>
    %399 = arith.mulf %386, %392 : vector<8x32xf32>
    %400 = arith.addf %398, %399 : vector<8x32xf32>
    %401 = math.tanh %400 : vector<8x32xf32>
    %402 = arith.mulf %397, %401 : vector<8x32xf32>
    %cst_136 = arith.constant dense<0.000000e+00> : vector<8x128xf32>
    %403 = tpu.matmul %402, %1, %cst_136 {dimension_numbers = #tpu.dot_dimension_numbers<[1], [0], [0], [1], [0, 0, 1, 1], [], []>} : vector<8x32xf32>, vector<32x128xf32>, vector<8x128xf32> -> vector<8x128xf32>
    %cst_137 = arith.constant dense<0.000000e+00> : vector<8x128xf32>
    %404 = tpu.matmul %374, %2, %cst_137 {dimension_numbers = #tpu.dot_dimension_numbers<[1], [0], [0], [1], [0, 0, 1, 1], [], []>} : vector<8x32xf32>, vector<32x128xf32>, vector<8x128xf32> -> vector<8x128xf32>
    %405 = arith.addf %403, %404 : vector<8x128xf32>
    %406 = vector.broadcast %3 : vector<1x128xf32> to vector<8x128xf32>
    %407 = arith.addf %405, %406 : vector<8x128xf32>
    %408 = math.tanh %407 : vector<8x128xf32>
    %409 = vector.extract_strided_slice %408 {offsets = [0, 0], sizes = [8, 32], strides = [1, 1]} : vector<8x128xf32> to vector<8x32xf32>
    %cst_138 = arith.constant 5.000000e-01 : f32
    %410 = vector.broadcast %cst_138 : f32 to vector<8x32xf32>
    %411 = arith.mulf %410, %409 : vector<8x32xf32>
    %cst_139 = arith.constant 5.000000e-01 : f32
    %412 = vector.broadcast %cst_139 : f32 to vector<8x32xf32>
    %413 = arith.addf %411, %412 : vector<8x32xf32>
    %414 = vector.extract_strided_slice %408 {offsets = [0, 32], sizes = [8, 32], strides = [1, 1]} : vector<8x128xf32> to vector<8x32xf32>
    %cst_140 = arith.constant 5.000000e-01 : f32
    %415 = vector.broadcast %cst_140 : f32 to vector<8x32xf32>
    %416 = arith.mulf %415, %414 : vector<8x32xf32>
    %cst_141 = arith.constant 5.000000e-01 : f32
    %417 = vector.broadcast %cst_141 : f32 to vector<8x32xf32>
    %418 = arith.addf %416, %417 : vector<8x32xf32>
    %419 = vector.extract_strided_slice %408 {offsets = [0, 64], sizes = [8, 32], strides = [1, 1]} : vector<8x128xf32> to vector<8x32xf32>
    %420 = vector.extract_strided_slice %408 {offsets = [0, 96], sizes = [8, 32], strides = [1, 1]} : vector<8x128xf32> to vector<8x32xf32>
    %cst_142 = arith.constant 5.000000e-01 : f32
    %421 = vector.broadcast %cst_142 : f32 to vector<8x32xf32>
    %422 = arith.mulf %421, %420 : vector<8x32xf32>
    %cst_143 = arith.constant 5.000000e-01 : f32
    %423 = vector.broadcast %cst_143 : f32 to vector<8x32xf32>
    %424 = arith.addf %422, %423 : vector<8x32xf32>
    %425 = arith.mulf %418, %372 : vector<8x32xf32>
    %426 = arith.mulf %413, %419 : vector<8x32xf32>
    %427 = arith.addf %425, %426 : vector<8x32xf32>
    %428 = math.tanh %427 : vector<8x32xf32>
    %429 = arith.mulf %424, %428 : vector<8x32xf32>
    %c7_i32_144 = arith.constant 7 : i32
    %c0_145 = arith.constant 0 : index
    %c0_146 = arith.constant 0 : index
    %430 = vector.load %arg7[%c0_145, %c0_146] : memref<1x32xf32, #tpu.memory_space<vmem>>, vector<1x32xf32>
    %431 = vector.broadcast %430 : vector<1x32xf32> to vector<8x32xf32>
    %432 = arith.mulf %429, %431 : vector<8x32xf32>
    %cst_147 = arith.constant dense<0.000000e+00> : vector<8xf32>
    %433 = vector.multi_reduction <add>, %432, %cst_147 [1] : vector<8x32xf32> to vector<8xf32>
    %434 = vector.shape_cast %433 : vector<8xf32> to vector<8x1xf32>
    %c0_148 = arith.constant 0 : index
    %c0_149 = arith.constant 0 : index
    %435 = vector.load %arg8[%c0_148, %c0_149] : memref<1x1xf32, #tpu.memory_space<vmem>>, vector<1x1xf32>
    %436 = vector.broadcast %435 : vector<1x1xf32> to vector<8x1xf32>
    %437 = arith.addf %434, %436 : vector<8x1xf32>
    %c0_150 = arith.constant 0 : index
    %c0_151 = arith.constant 0 : index
    %438 = vector.load %arg9[%c0_150, %c0_151] : memref<8x1xf32, #tpu.memory_space<vmem>>, vector<8x1xf32>
    tpu.vector_store %arg9[%c0_150, %c0_151], %437 {strides = array<i32>} : memref<8x1xf32, #tpu.memory_space<vmem>>, vector<8x1xf32>,
    return
  }
}

</mosaic_0001>

<bundles_post_ra>
// kernel: tpu_custom_call.1
= control target key start
LH: loop header
LB: loop body
LE: loop exit
PB: predicated region body
PF: predicated region fallthrough
CT: control target
= control target key end

     0   :  { %s3280_s0 = inlined_call_operand.vmem [shape: f32[64,8], index: 0, kind: input, shape index: {}]   ;;  %s3281_s1 = inlined_call_operand.vmem [shape: f32[8,128], index: 1, kind: input, shape index: {}]   ;;  %s3282_s2 = inlined_call_operand.vmem [shape: f32[32,128], index: 2, kind: input, shape index: {}]   ;;  %s3283_s3 = inlined_call_operand.vmem [shape: f32[1,128], index: 3, kind: input, shape index: {}]   ;;  %s3284_s4 = inlined_call_operand.vmem [shape: f32[32,128], index: 4, kind: input, shape index: {}]   ;;  %s3285_s5 = inlined_call_operand.hbm [shape: f32[32,128], index: 5, kind: input, shape index: {}]   ;;  %s3286_s6 = inlined_call_operand.vmem [shape: f32[1,128], index: 6, kind: input, shape index: {}]   ;;  %s3287_s7 = inlined_call_operand.vmem [shape: f32[1,32], index: 7, kind: input, shape index: {}]   ;;  %s3288_s8 = inlined_call_operand.<no memory space> [shape: f32[1,1], index: 8, kind: input, shape index: {}]   ;;  %s3289_s9 = inlined_call_operand.vmem [shape: f32[8,1], index: 9, kind: output, shape index: {}]  }
   0x1   :  { %v14_v0 = vstv %s3288_s8 }
   0x2   :  { %15 = vst [vmem:[#allocation3] sm:$0x1] %v14_v0 }
   0x3   :  { %16 = vsyncpa [#allocation5], 0  ;;  %s2852_s11 = smov [#allocation4]   ;;  %s2828_s15 = scalar_lea.hbm %s3285_s5, 512 }
   0x4   :  { %s32_s12 = sshll.u32 %s2852_s11, 4  ;;  %p2829_p0 = scmp.ne.s32.totalorder %s3285_s5, %s2828_s15  ;;  %s33_s12 = int_to_ptr.vmem [resolvable:$true] %s32_s12 }
   0x5   :  { %p2832_p1 = scmp.lt.u32.totalorder %s2828_s15, %s3285_s5 }
   0x7   :  { %p2834_p2 = pnand %p2832_p1, %p2829_p0 }
   0x9   :  { %2837 = shalt.err (!%p2834_p2)
}
   0xa   :  { %s2838_s8 = scalar_lea.vmem %s33_s12, 512  ;;  %p2843_p4 = scmp.lt.s32.totalorder %s33_s12, %s33_s12 }
   0xb   :  { %p2839_p3 = scmp.ne.s32.totalorder %s33_s12, %s2838_s8  ;;  %p2844_p5 = scmp.lt.s32.totalorder %s2838_s8, %s2838_s8 }
   0xd   :  { %p2845_p6 = por %p2844_p5, %p2843_p4 }
   0xf   :  { %p2846_p7 = pnand %p2845_p6, %p2839_p3 }
  0x11   :  { %2849 = shalt.err (!%p2846_p7)
}
  0x12   :  { %s2853_s20 = smov 128   ;;  %s2854_s21 = smov 8  }
  0x13   :  { %38 = dma.hbm_to_vmem [thread:$0]  %s3285_s5, 512, %s33_s12, [#allocation5], %s2853_s20, %s2853_s20, %s2854_s21  }
  0x14   :  { %2850 = dma.done.wait [#allocation5], 512  }
  0x15   :  { %2851 = vsyncadd [#allocation5], 4294966784  ;;  %vm77_vm0 = vcmask 64512   ;;  %v69_v1 = vld [vmem:[%s3281_s1] sm:$0xff]  ;;  %v62_v3 = vld [vmem:[%s3280_s0 + $0x8] sm:$0xff]  ;;  %s2855_s1 = smov 64  }
  0x16   :  { %v61_v2 = vld [vmem:[%s3280_s0] sm:$0xff]  ;;  %2367 = vmatprep.subr.mxu0 %v69_v1  ;;  %v53_v14 = vld [vmem:[%s3284_s4 + $0x8] sm:$0xff]  ;;  %v54_v15 = vld [vmem:[%s3284_s4 + $0x10] sm:$0xff]  ;;  %v2856_v16 = vmov 0.0|0.0   ;;  %vm2857_vm1 = vmmov 0   ;;  %v2858_v19 = vmov 0.0  }
  0x17   :  { %2369 = vmatprep.mubr.msk.f32.mxu0 %vm77_vm0, %v61_v2  ;;  %2368 = vmatpush3.msra.mxu0 %v69_v1  ;;  %v2940_v4 = vld [vmem:[%s3283_s3] ss:$0 sm:$0xff]  ;;  %v55_v18 = vld [vmem:[%s3284_s4 + $0x18] sm:$0xff]  ;;  %s2859_s17 = smov 96   ;;  %v49_v25 = vld [vmem:[%s3282_s2 + $0x8] sm:$0xff]  ;;  %vm239_vm2 = vcmask 261120  }
  0x18   :  { %2370 = vmatmul.mubr.msk.f32.vlgmr.msra.gmra.mrb[0].mxu0 %vm77_vm0, %v62_v3  ;;  %v52_v13 = vld [vmem:[%s3284_s4] sm:$0xff]  ;;  %2623 = vmatprep.subr.bf16.mxu1 %v2856_v16  ;;  %v2963_v20 = vpack.c.bf16 %v55_v18, %v54_v15  ;;  %s2860_s4 = smov 32   ;;  %v50_v27 = vld [vmem:[%s3282_s2 + $0x10] sm:$0xff]  ;;  %v51_v28 = vld [vmem:[%s3282_s2 + $0x18] sm:$0xff]  ;;  %vm2207_vm3 = vcmask 7168  }
  0x19   :  { %v2954_v17 = vpack.c.bf16 %v53_v14, %v52_v13  ;;  %2389 = vmatprep.mubr.msk.f32.mxu1 %vm2857_vm1, %v2858_v19  ;;  %2635 = vmatprep.subr.bf16.mxu0 %v2856_v16  ;;  %v48_v24 = vld [vmem:[%s3282_s2] sm:$0xff]  ;;  %v2987_v30 = vpack.c.bf16 %v51_v28, %v50_v27  ;;  %v63_v49 = vld [vmem:[%s3280_s0 + $0x10] sm:$0xff]  ;;  %v64_v50 = vld [vmem:[%s3280_s0 + $0x18] sm:$0xff] }
  0x1a   :  { %v2977_v26 = vpack.c.bf16 %v49_v25, %v48_v24  ;;  %v3005_v34 = vld [vmem:[%s3286_s6] ss:$0 sm:$0xff]  ;;  %2372 = vmatprep.mubr.msk.f32.mxu0 %vm77_vm0, %v63_v49  ;;  %v56_v52 = vld [vmem:[#allocation4] sm:$0xff]  ;;  %v57_v53 = vld [vmem:[#allocation4 + $0x8] sm:$0xff] }
  0x1b   :  { %2625 = vmatpush3.bf16.msra.mxu1 %v2954_v17  ;;  %v65_v51 = vld [vmem:[%s3280_s0 + $0x20] sm:$0xff]  ;;  %v3025_v54 = vpack.c.bf16 %v57_v53, %v56_v52  ;;  %v66_v55 = vld [vmem:[%s3280_s0 + $0x28] sm:$0xff]  ;;  %v67_v56 = vld [vmem:[%s3280_s0 + $0x30] sm:$0xff] }
  0x1c   :  { %2626 = vmatprep.subr.bf16.mxu1 %v2856_v16  ;;  %2373 = vmatmul.mubr.msk.f32.gmra.mrb[2].mxu0 %vm77_vm0, %v64_v50  ;;  %v58_v60 = vld [vmem:[#allocation4 + $0x10] sm:$0xff]  ;;  %v59_v61 = vld [vmem:[#allocation4 + $0x18] sm:$0xff] }
  0x1d   :  { %2375 = vmatprep.mubr.msk.f32.mxu0 %vm77_vm0, %v65_v51  ;;  %2637 = vmatpush3.bf16.msra.mxu0 %v3025_v54  ;;  %v68_v63 = vld [vmem:[%s3280_s0 + $0x38] sm:$0xff]  ;;  %v3042_v0 = vpack.c.bf16 %v59_v61, %v58_v60 }
  0x1e   :  { %2638 = vmatprep.subr.bf16.mxu0 %v2856_v16 }
  0x1f   :  { %2628 = vmatpush3.bf16.msra.mxu1 %v2963_v20 }
  0x20   :  { %2629 = vmatprep.subr.bf16.mxu1 %v2856_v16  ;;  %2376 = vmatmul.mubr.msk.f32.gmra.mrb[4].mxu0 %vm77_vm0, %v66_v55 }
  0x21   :  { %2378 = vmatprep.mubr.msk.f32.mxu0 %vm77_vm0, %v67_v56  ;;  %2640 = vmatpush3.bf16.msra.mxu0 %v3042_v0 }
  0x22   :  { %2647 = vmatprep.subr.bf16.mxu0 %v2856_v16 }
  0x24   :  { %2379 = vmatmul.mubr.msk.f32.gmra.mrb[6].mxu0 %vm77_vm0, %v68_v63 }
  0x25   :  { %2411 = vmatprep.mubr.msk.f32.mxu0 %vm2857_vm1, %v2858_v19 }
  0xeb   :  { %v2371_v5 = vpop.f32.mrb[0].mxu0 }
  0xec   :  { %v168_v6 = vpop.f32.mrb[1].mxu0  ;;  %v174_v33 = vadd.f32 %v2371_v5, %v2940_v4 }
  0xed   :  { %v169_v7 = vadd.f32 %v2940_v4, %v168_v6 }
  0xef   :  { %2764 = vtanh.f32 %v169_v7  ;;  %v3054_v6 = vpop.f32.mrb[2].mxu0 }
  0xf0   :  { %v178_v7 = vpop.f32.mrb[3].mxu0 }
  0xf9   :  { %v2765_v8 = vpop.eup %2764 }
  0xfa   :  { %220 = vrot.lane.b32.xlu0 %v2765_v8, %s2855_s1  ;;  %v217_v9 = vmul.f32 0.5, %v2765_v8  ;;  %v3056_v8 = vpop.f32.mrb[4].mxu0 }
  0xfc   :  { %v218_v10 = vadd.f32 0.5, %v217_v9  ;;  %v3058_v9 = vpop.f32.mrb[5].mxu0 }
  0xfd   :  { %v3068_v13 = vpop.f32.mrb[6].mxu0 }
  0xfe   :  { %v3070_v14 = vpop.f32.mrb[7].mxu0 }
 0x16c   :  { %v221_v11 = vpop.permute.xlu0 %220 }
 0x16d   :  { %v223_v12 = vmul.f32 %v221_v11, %v218_v10 }
 0x16f   :  { %2766 = vtanh.f32 %v223_v12 }
 0x179   :  { %v2767_v21 = vpop.eup %2766 }
 0x17a   :  { %226 = vrot.lane.b32.xlu0 %v2767_v21, %s2859_s17 }
 0x17e   :  { %403 = vrot.lane.b32.xlu0 %v223_v12, %s2860_s4 }
 0x1ec   :  { %v227_v22 = vpop.permute.xlu0 %226 }
 0x1ed   :  { %v229_v23 = vmul.f32 %v227_v22, %v218_v10  ;;  %v179_v22 = vadd.f32 %v2940_v4, %v178_v7 }
 0x1ef   :  { %237 = vrot.lane.b32.xlu1 %v229_v23, %s2860_s4 }
 0x1f0   :  { %v404_v58 = vpop.permute.xlu0 %403 }
 0x261   :  { %v238_v29 = vpop.permute.xlu1 %237 }
 0x262   :  { %2390 = vmatmul.mubr.msk.f32.vlgmr.msra.gmra.mrb[0].mxu1 %vm239_vm2, %v238_v29 }
 0x263   :  { %2631 = vmatpush3.bf16.msra.mxu1 %v2977_v26  ;;  %2400 = vmatprep.mubr.msk.f32.mxu1 %vm2857_vm1, %v2858_v19 }
 0x264   :  { %2632 = vmatprep.subr.bf16.mxu1 %v2856_v16 }
 0x267   :  { %2634 = vmatpush3.bf16.msra.mxu1 %v2987_v30 }
 0x268   :  { %2641 = vmatprep.subr.bf16.mxu1 %v2856_v16 }
 0x26a   :  { %2401 = vmatmul.mubr.msk.f32.vlgmr.msra.gmra.mrb[2].mxu1 %vm239_vm2, %v238_v29 }
 0x26b   :  { %2643 = vmatpush3.bf16.msra.mxu1 %v2954_v17  ;;  %2422 = vmatprep.mubr.msk.f32.mxu1 %vm2857_vm1, %v2858_v19 }
 0x26c   :  { %2644 = vmatprep.subr.bf16.mxu1 %v2856_v16 }
 0x26f   :  { %2646 = vmatpush3.bf16.msra.mxu1 %v2963_v20 }
 0x270   :  { %2653 = vmatprep.subr.bf16.mxu1 %v2856_v16 }
 0x335   :  { %v308_v31 = vpop.f32.mrb[0].mxu1 }
 0x336   :  { %v2391_v32 = vpop.f32.mrb[1].mxu1  ;;  %v309_v38 = vadd.f32 %v3005_v34, %v308_v31 }
 0x33d   :  { %v394_v35 = vpop.f32.mrb[2].mxu1 }
 0x33e   :  { %v398_v36 = vadd.f32 %v394_v35, %v174_v33  ;;  %v2402_v37 = vpop.f32.mrb[3].mxu1 }
 0x340   :  { %2768 = vtanh.f32 %v398_v36 }
 0x341   :  { %2770 = vtanh.f32 %v309_v38 }
 0x34a   :  { %v2769_v39 = vpop.eup %2768 }
 0x34b   :  { %408 = vrot.lane.b32.xlu1 %v2769_v39, %s2855_s1  ;;  %v2771_v40 = vpop.eup %2770  ;;  %v400_v41 = vmul.f32 0.5, %v2769_v39 }
 0x34c   :  { %v313_v43 = vmul.f32 0.5, %v2771_v40 }
 0x34d   :  { %v401_v42 = vadd.f32 0.5, %v400_v41 }
 0x34e   :  { %v314_v46 = vadd.f32 0.5, %v313_v43 }
 0x34f   :  { %316 = vrot.lane.b32.xlu1 %v2771_v40, %s2855_s1  ;;  %v406_v59 = vmul.f32 %v404_v58, %v401_v42 }
 0x3bd   :  { %v409_v44 = vpop.permute.xlu1 %408 }
 0x3be   :  { %v411_v45 = vmul.f32 %v409_v44, %v401_v42 }
 0x3c0   :  { %413 = vrot.lane.b32.xlu0 %v411_v45, %s2860_s4 }
 0x3c1   :  { %v317_v47 = vpop.permute.xlu1 %316 }
 0x3c2   :  { %v3011_v48 = vmul.f32 %v317_v47, %v314_v46 }
 0x3c4   :  { %2772 = vtanh.f32 %v3011_v48 }
 0x3ce   :  { %v2773_v57 = vpop.eup %2772 }
 0x3cf   :  { %322 = vrot.lane.b32.xlu1 %v2773_v57, %s2859_s17 }
 0x432   :  { %v414_v62 = vpop.permute.xlu0 %413 }
 0x433   :  { %v3044_v1 = vadd.f32 %v414_v62, %v406_v59 }
 0x435   :  { %2774 = vtanh.f32 %v3044_v1 }
 0x43f   :  { %v2775_v2 = vpop.eup %2774 }
 0x440   :  { %419 = vrot.lane.b32.xlu0 %v2775_v2, %s2855_s1  ;;  %v184_v2 = vadd.f32 %v3054_v6, %v2940_v4 }
 0x441   :  { %v323_v3 = vpop.permute.xlu1 %322 }
 0x442   :  { %v325_v5 = vmul.f32 %v323_v3, %v314_v46 }
 0x444   :  { %424 = vrot.lane.b32.xlu1 %v325_v5, %s2860_s4 }
 0x4b2   :  { %v420_v10 = vpop.permute.xlu0 %419 }
 0x4b3   :  { %v422_v11 = vmul.f32 %v420_v10, %v401_v42 }
 0x4b5   :  { %499 = vrot.lane.b32.xlu0 %v422_v11, %s2860_s4 }
 0x4b6   :  { %v425_v12 = vpop.permute.xlu1 %424 }
 0x4b7   :  { %2412 = vmatmul.mubr.msk.f32.vlgmr.msra.gmra.mrb[8].mxu0 %vm239_vm2, %v425_v12 }
 0x4b8   :  { %2649 = vmatpush3.bf16.msra.mxu0 %v2977_v26  ;;  %2433 = vmatprep.mubr.msk.f32.mxu0 %vm2857_vm1, %v2858_v19 }
 0x4b9   :  { %2650 = vmatprep.subr.bf16.mxu0 %v2856_v16 }
 0x4bc   :  { %2652 = vmatpush3.bf16.msra.mxu0 %v2987_v30 }
 0x4bd   :  { %2659 = vmatprep.subr.bf16.mxu0 %v2856_v16 }
 0x527   :  { %v500_v15 = vpop.permute.xlu0 %499 }
 0x528   :  { %2423 = vmatmul.mubr.msk.f32.vlgmr.msra.gmra.mrb[4].mxu1 %vm239_vm2, %v500_v15  ;;  %2434 = vmatmul.mubr.msk.f32.vlgmr.msra.gmra.mrb[10].mxu0 %vm239_vm2, %v500_v15 }
 0x529   :  { %2661 = vmatpush3.bf16.msra.mxu0 %v2954_v17  ;;  %2655 = vmatpush3.bf16.msra.mxu1 %v3025_v54 }
 0x52a   :  { %2662 = vmatprep.subr.bf16.mxu0 %v2856_v16  ;;  %2656 = vmatprep.subr.bf16.mxu1 %v2856_v16 }
 0x52b   :  { %2455 = vmatprep.mubr.msk.f32.mxu0 %vm2857_vm1, %v2858_v19  ;;  %2444 = vmatprep.mubr.msk.f32.mxu1 %vm2857_vm1, %v2858_v19 }
 0x52d   :  { %2664 = vmatpush3.bf16.msra.mxu0 %v2963_v20  ;;  %2658 = vmatpush3.bf16.msra.mxu1 %v3042_v0 }
 0x52e   :  { %2665 = vmatprep.subr.bf16.mxu1 %v2856_v16  ;;  %2671 = vmatprep.subr.bf16.mxu0 %v2856_v16 }
 0x58a   :  { %v494_v18 = vpop.f32.mrb[8].mxu0 }
 0x58b   :  { %v2413_v21 = vpop.f32.mrb[9].mxu0 }
 0x5fb   :  { %v569_v23 = vpop.f32.mrb[4].mxu1  ;;  %v666_v24 = vpop.f32.mrb[10].mxu0 }
 0x5fc   :  { %v570_v25 = vadd.f32 %v569_v23, %v494_v18  ;;  %v670_v27 = vadd.f32 %v666_v24, %v179_v22  ;;  %v2424_v28 = vpop.f32.mrb[5].mxu1  ;;  %v2435_v29 = vpop.f32.mrb[11].mxu0 }
 0x5fe   :  { %v573_v31 = vadd.f32 %v3005_v34, %v570_v25  ;;  %2776 = vtanh.f32 %v670_v27 }
 0x600   :  { %2778 = vtanh.f32 %v573_v31 }
 0x608   :  { %v2777_v32 = vpop.eup %2776 }
 0x609   :  { %676 = vrot.lane.b32.xlu0 %v2777_v32, %s2855_s1  ;;  %v672_v35 = vmul.f32 0.5, %v2777_v32 }
 0x60a   :  { %v2779_v33 = vpop.eup %2778 }
 0x60b   :  { %583 = vrot.lane.b32.xlu1 %v2779_v33, %s2855_s1  ;;  %v575_v36 = vmul.f32 0.5, %v2779_v33  ;;  %v673_v37 = vadd.f32 0.5, %v672_v35 }
 0x60d   :  { %v576_v40 = vadd.f32 0.5, %v575_v36  ;;  %v674_v44 = vmul.f32 %v673_v37, %v3044_v1 }
 0x60f   :  { %578 = vrot.lane.b32.xlu1 %v3011_v48, %s2860_s4 }
 0x67b   :  { %v677_v38 = vpop.permute.xlu0 %676 }
 0x67c   :  { %v679_v39 = vmul.f32 %v677_v38, %v673_v37 }
 0x67d   :  { %v584_v41 = vpop.permute.xlu1 %583 }
 0x67e   :  { %v586_v42 = vmul.f32 %v584_v41, %v576_v40  ;;  %681 = vrot.lane.b32.xlu1 %v679_v39, %s2860_s4 }
 0x680   :  { %588 = vrot.lane.b32.xlu0 %v586_v42, %s2860_s4 }
 0x681   :  { %v579_v43 = vpop.permute.xlu1 %578 }
 0x682   :  { %v581_v46 = vmul.f32 %v579_v43, %v576_v40 }
 0x6f0   :  { %v682_v45 = vpop.permute.xlu1 %681 }
 0x6f1   :  { %v3095_v47 = vadd.f32 %v682_v45, %v674_v44  ;;  %v189_v45 = vadd.f32 %v2940_v4, %v3058_v9 }
 0x6f2   :  { %v589_v48 = vpop.permute.xlu0 %588 }
 0x6f3   :  { %2780 = vtanh.f32 %v3095_v47  ;;  %v591_v49 = vadd.f32 %v589_v48, %v581_v46 }
 0x6f5   :  { %2782 = vtanh.f32 %v591_v49 }
 0x6fd   :  { %v2781_v50 = vpop.eup %2780 }
 0x6fe   :  { %687 = vrot.lane.b32.xlu1 %v2781_v50, %s2855_s1 }
 0x6ff   :  { %v2783_v51 = vpop.eup %2782 }
 0x700   :  { %594 = vrot.lane.b32.xlu0 %v2783_v51, %s2855_s1 }
 0x770   :  { %v688_v52 = vpop.permute.xlu1 %687 }
 0x771   :  { %v690_v53 = vmul.f32 %v688_v52, %v673_v37 }
 0x772   :  { %v595_v55 = vpop.permute.xlu0 %594 }
 0x773   :  { %v597_v56 = vmul.f32 %v595_v55, %v576_v40  ;;  %767 = vrot.lane.b32.xlu1 %v690_v53, %s2860_s4 }
 0x775   :  { %692 = vrot.lane.b32.xlu0 %v597_v56, %s2860_s4 }
 0x7e5   :  { %v768_v57 = vpop.permute.xlu1 %767 }
 0x7e6   :  { %2456 = vmatmul.mubr.msk.f32.vlgmr.msra.gmra.mrb[12].mxu0 %vm239_vm2, %v768_v57 }
 0x7e7   :  { %v693_v58 = vpop.permute.xlu0 %692  ;;  %2673 = vmatpush3.bf16.msra.mxu0 %v3025_v54  ;;  %2477 = vmatprep.mubr.msk.f32.mxu0 %vm2857_vm1, %v2858_v19 }
 0x7e8   :  { %2445 = vmatmul.mubr.msk.f32.vlgmr.msra.gmra.mrb[6].mxu1 %vm239_vm2, %v693_v58  ;;  %2674 = vmatprep.subr.bf16.mxu0 %v2856_v16 }
 0x7e9   :  { %2667 = vmatpush3.bf16.msra.mxu1 %v2977_v26  ;;  %2466 = vmatprep.mubr.msk.f32.mxu1 %vm2857_vm1, %v2858_v19 }
 0x7ea   :  { %2668 = vmatprep.subr.bf16.mxu1 %v2856_v16 }
 0x7eb   :  { %2676 = vmatpush3.bf16.msra.mxu0 %v3042_v0 }
 0x7ec   :  { %2683 = vmatprep.subr.bf16.mxu0 %v2856_v16 }
 0x7ed   :  { %2670 = vmatpush3.bf16.msra.mxu1 %v2987_v30 }
 0x7ee   :  { %2677 = vmatprep.subr.bf16.mxu1 %v2856_v16 }
 0x7f0   :  { %2467 = vmatmul.mubr.msk.f32.vlgmr.msra.gmra.mrb[8].mxu1 %vm239_vm2, %v768_v57 }
 0x7f1   :  { %2679 = vmatpush3.bf16.msra.mxu1 %v2954_v17  ;;  %2488 = vmatprep.mubr.msk.f32.mxu1 %vm2857_vm1, %v2858_v19 }
 0x7f2   :  { %2680 = vmatprep.subr.bf16.mxu1 %v2856_v16 }
 0x7f5   :  { %2682 = vmatpush3.bf16.msra.mxu1 %v2963_v20 }
 0x7f6   :  { %2689 = vmatprep.subr.bf16.mxu1 %v2856_v16 }
 0x8b9   :  { %v837_v59 = vpop.f32.mrb[12].mxu0 }
 0x8ba   :  { %v2457_v60 = vpop.f32.mrb[13].mxu0 }
 0x8bb   :  { %v762_v61 = vpop.f32.mrb[6].mxu1 }
 0x8bc   :  { %v838_v62 = vadd.f32 %v837_v59, %v762_v61  ;;  %v2446_v63 = vpop.f32.mrb[7].mxu1 }
 0x8be   :  { %v841_v1 = vadd.f32 %v3005_v34, %v838_v62 }
 0x8c0   :  { %2784 = vtanh.f32 %v841_v1 }
 0x8c3   :  { %v930_v3 = vpop.f32.mrb[8].mxu1 }
 0x8c4   :  { %v934_v5 = vadd.f32 %v930_v3, %v184_v2  ;;  %v2468_v7 = vpop.f32.mrb[9].mxu1 }
 0x8c6   :  { %2786 = vtanh.f32 %v934_v5 }
 0x8ca   :  { %v2785_v10 = vpop.eup %2784 }
 0x8cb   :  { %847 = vrot.lane.b32.xlu0 %v2785_v10, %s2855_s1  ;;  %v843_v12 = vmul.f32 0.5, %v2785_v10 }
 0x8cd   :  { %v844_v15 = vadd.f32 0.5, %v843_v12 }
 0x8cf   :  { %v845_v25 = vmul.f32 %v844_v15, %v591_v49 }
 0x8d0   :  { %v2787_v11 = vpop.eup %2786 }
 0x8d1   :  { %940 = vrot.lane.b32.xlu1 %v2787_v11, %s2855_s1  ;;  %v936_v22 = vmul.f32 0.5, %v2787_v11 }
 0x8d3   :  { %v937_v23 = vadd.f32 0.5, %v936_v22 }
 0x8d5   :  { %v938_v29 = vmul.f32 %v937_v23, %v3095_v47 }
 0x93d   :  { %v848_v18 = vpop.permute.xlu0 %847 }
 0x93e   :  { %v850_v21 = vmul.f32 %v848_v18, %v844_v15 }
 0x940   :  { %852 = vrot.lane.b32.xlu0 %v850_v21, %s2860_s4 }
 0x943   :  { %v941_v24 = vpop.permute.xlu1 %940 }
 0x944   :  { %v943_v6 = vmul.f32 %v941_v24, %v937_v23 }
 0x946   :  { %945 = vrot.lane.b32.xlu1 %v943_v6, %s2860_s4 }
 0x9b2   :  { %v853_v27 = vpop.permute.xlu0 %852 }
 0x9b3   :  { %v855_v28 = vadd.f32 %v853_v27, %v845_v25 }
 0x9b5   :  { %2788 = vtanh.f32 %v855_v28 }
 0x9b8   :  { %v946_v31 = vpop.permute.xlu1 %945 }
 0x9b9   :  { %v948_v32 = vadd.f32 %v946_v31, %v938_v29  ;;  %v194_v29 = vadd.f32 %v3056_v8, %v2940_v4 }
 0x9bb   :  { %2790 = vtanh.f32 %v948_v32 }
 0x9bf   :  { %v2789_v33 = vpop.eup %2788 }
 0x9c0   :  { %858 = vrot.lane.b32.xlu0 %v2789_v33, %s2855_s1 }
 0x9c5   :  { %v2791_v35 = vpop.eup %2790 }
 0x9c6   :  { %951 = vrot.lane.b32.xlu1 %v2791_v35, %s2855_s1 }
 0xa32   :  { %v859_v36 = vpop.permute.xlu0 %858 }
 0xa33   :  { %v861_v37 = vmul.f32 %v859_v36, %v844_v15 }
 0xa35   :  { %956 = vrot.lane.b32.xlu0 %v861_v37, %s2860_s4 }
 0xa38   :  { %v952_v38 = vpop.permute.xlu1 %951 }
 0xa39   :  { %v954_v39 = vmul.f32 %v952_v38, %v937_v23 }
 0xa3b   :  { %1031 = vrot.lane.b32.xlu1 %v954_v39, %s2860_s4 }
 0xaa7   :  { %v957_v40 = vpop.permute.xlu0 %956 }
 0xaa8   :  { %2478 = vmatmul.mubr.msk.f32.vlgmr.msra.gmra.mrb[14].mxu0 %vm239_vm2, %v957_v40 }
 0xaa9   :  { %2685 = vmatpush3.bf16.msra.mxu0 %v2977_v26  ;;  %2499 = vmatprep.mubr.msk.f32.mxu0 %vm2857_vm1, %v2858_v19 }
 0xaaa   :  { %2686 = vmatprep.subr.bf16.mxu0 %v2856_v16 }
 0xaad   :  { %2688 = vmatpush3.bf16.msra.mxu0 %v2987_v30  ;;  %v1032_v41 = vpop.permute.xlu1 %1031 }
 0xaae   :  { %2489 = vmatmul.mubr.msk.f32.vlgmr.msra.gmra.mrb[10].mxu1 %vm239_vm2, %v1032_v41  ;;  %2695 = vmatprep.subr.bf16.mxu0 %v2856_v16 }
 0xaaf   :  { %2691 = vmatpush3.bf16.msra.mxu1 %v3025_v54  ;;  %2510 = vmatprep.mubr.msk.f32.mxu1 %vm2857_vm1, %v2858_v19 }
 0xab0   :  { %2500 = vmatmul.mubr.msk.f32.vlgmr.msra.gmra.mrb[16].mxu0 %vm239_vm2, %v1032_v41  ;;  %2692 = vmatprep.subr.bf16.mxu1 %v2856_v16 }
 0xab1   :  { %2697 = vmatpush3.bf16.msra.mxu0 %v2954_v17  ;;  %2521 = vmatprep.mubr.msk.f32.mxu0 %vm2857_vm1, %v2858_v19 }
 0xab2   :  { %2698 = vmatprep.subr.bf16.mxu0 %v2856_v16 }
 0xab3   :  { %2694 = vmatpush3.bf16.msra.mxu1 %v3042_v0 }
 0xab4   :  { %2701 = vmatprep.subr.bf16.mxu1 %v2856_v16 }
 0xab5   :  { %2700 = vmatpush3.bf16.msra.mxu0 %v2963_v20 }
 0xab6   :  { %2707 = vmatprep.subr.bf16.mxu0 %v2856_v16 }
 0xb7b   :  { %v1026_v42 = vpop.f32.mrb[14].mxu0 }
 0xb7c   :  { %v2479_v43 = vpop.f32.mrb[15].mxu0 }
 0xb81   :  { %v1101_v44 = vpop.f32.mrb[10].mxu1 }
 0xb82   :  { %v1102_v46 = vadd.f32 %v1101_v44, %v1026_v42  ;;  %v2490_v47 = vpop.f32.mrb[11].mxu1 }
 0xb83   :  { %v1194_v48 = vpop.f32.mrb[16].mxu0 }
 0xb84   :  { %v1105_v49 = vadd.f32 %v3005_v34, %v1102_v46  ;;  %v1198_v50 = vadd.f32 %v1194_v48, %v189_v45  ;;  %v2501_v51 = vpop.f32.mrb[17].mxu0 }
 0xb86   :  { %2792 = vtanh.f32 %v1105_v49 }
 0xb87   :  { %2794 = vtanh.f32 %v1198_v50 }
 0xb90   :  { %v2793_v52 = vpop.eup %2792 }
 0xb91   :  { %v2795_v53 = vpop.eup %2794  ;;  %1111 = vrot.lane.b32.xlu0 %v2793_v52, %s2855_s1  ;;  %v1107_v55 = vmul.f32 0.5, %v2793_v52 }
 0xb92   :  { %1204 = vrot.lane.b32.xlu1 %v2795_v53, %s2855_s1  ;;  %v1200_v56 = vmul.f32 0.5, %v2795_v53 }
 0xb93   :  { %v1108_v57 = vadd.f32 0.5, %v1107_v55 }
 0xb94   :  { %v1201_v58 = vadd.f32 0.5, %v1200_v56 }
 0xb95   :  { %v1109_v62 = vmul.f32 %v1108_v57, %v855_v28 }
 0xb96   :  { %v1202_v63 = vmul.f32 %v1201_v58, %v948_v32 }
 0xc03   :  { %v1112_v9 = vpop.permute.xlu0 %1111 }
 0xc04   :  { %v1205_v59 = vpop.permute.xlu1 %1204  ;;  %v1114_v60 = vmul.f32 %v1112_v9, %v1108_v57 }
 0xc05   :  { %v1207_v61 = vmul.f32 %v1205_v59, %v1201_v58 }
 0xc06   :  { %1116 = vrot.lane.b32.xlu0 %v1114_v60, %s2860_s4 }
 0xc07   :  { %1209 = vrot.lane.b32.xlu1 %v1207_v61, %s2860_s4 }
 0xc78   :  { %v1117_v1 = vpop.permute.xlu0 %1116 }
 0xc79   :  { %v1210_v2 = vpop.permute.xlu1 %1209  ;;  %v1119_v3 = vadd.f32 %v1117_v1, %v1109_v62 }
 0xc7a   :  { %v3163_v5 = vadd.f32 %v1210_v2, %v1202_v63  ;;  %v199_v63 = vadd.f32 %v2940_v4, %v3070_v14 }
 0xc7b   :  { %2796 = vtanh.f32 %v1119_v3 }
 0xc7c   :  { %2798 = vtanh.f32 %v3163_v5 }
 0xc85   :  { %v2797_v7 = vpop.eup %2796 }
 0xc86   :  { %v2799_v10 = vpop.eup %2798  ;;  %1122 = vrot.lane.b32.xlu0 %v2797_v7, %s2855_s1 }
 0xc87   :  { %1215 = vrot.lane.b32.xlu1 %v2799_v10, %s2855_s1 }
 0xcf8   :  { %v1123_v11 = vpop.permute.xlu0 %1122 }
 0xcf9   :  { %v1216_v12 = vpop.permute.xlu1 %1215  ;;  %v1125_v15 = vmul.f32 %v1123_v11, %v1108_v57 }
 0xcfa   :  { %v1218_v18 = vmul.f32 %v1216_v12, %v1201_v58 }
 0xcfb   :  { %1220 = vrot.lane.b32.xlu0 %v1125_v15, %s2860_s4 }
 0xcfc   :  { %1295 = vrot.lane.b32.xlu1 %v1218_v18, %s2860_s4 }
 0xd6d   :  { %v1221_v21 = vpop.permute.xlu0 %1220 }
 0xd6e   :  { %v1296_v22 = vpop.permute.xlu1 %1295  ;;  %2511 = vmatmul.mubr.msk.f32.vlgmr.msra.gmra.mrb[12].mxu1 %vm239_vm2, %v1221_v21 }
 0xd6f   :  { %2522 = vmatmul.mubr.msk.f32.vlgmr.msra.gmra.mrb[18].mxu0 %vm239_vm2, %v1296_v22  ;;  %2703 = vmatpush3.bf16.msra.mxu1 %v2977_v26 }
 0xd70   :  { %2704 = vmatprep.subr.bf16.mxu1 %v2856_v16  ;;  %2532 = vmatprep.mubr.msk.f32.mxu1 %vm2857_vm1, %v2858_v19 }
 0xd71   :  { %2709 = vmatpush3.bf16.msra.mxu0 %v3025_v54  ;;  %2543 = vmatprep.mubr.msk.f32.mxu0 %vm2857_vm1, %v2858_v19 }
 0xd72   :  { %2710 = vmatprep.subr.bf16.mxu0 %v2856_v16 }
 0xd73   :  { %2706 = vmatpush3.bf16.msra.mxu1 %v2987_v30 }
 0xd74   :  { %2713 = vmatprep.subr.bf16.mxu1 %v2856_v16 }
 0xd75   :  { %2712 = vmatpush3.bf16.msra.mxu0 %v3042_v0 }
 0xd76   :  { %2533 = vmatmul.mubr.msk.f32.vlgmr.msra.gmra.mrb[14].mxu1 %vm239_vm2, %v1296_v22  ;;  %2719 = vmatprep.subr.bf16.mxu0 %v2856_v16 }
 0xd77   :  { %2715 = vmatpush3.bf16.msra.mxu1 %v2954_v17  ;;  %2554 = vmatprep.mubr.msk.f32.mxu1 %vm2857_vm1, %v2858_v19 }
 0xd78   :  { %2716 = vmatprep.subr.bf16.mxu1 %v2856_v16 }
 0xd7b   :  { %2718 = vmatpush3.bf16.msra.mxu1 %v2963_v20 }
 0xd7c   :  { %2725 = vmatprep.subr.bf16.mxu1 %v2856_v16 }
 0xe41   :  { %v1290_v23 = vpop.f32.mrb[12].mxu1 }
 0xe42   :  { %v1365_v24 = vpop.f32.mrb[18].mxu0  ;;  %v2512_v6 = vpop.f32.mrb[13].mxu1 }
 0xe43   :  { %v1366_v25 = vadd.f32 %v1365_v24, %v1290_v23  ;;  %v2523_v27 = vpop.f32.mrb[19].mxu0 }
 0xe45   :  { %v1369_v28 = vadd.f32 %v3005_v34, %v1366_v25 }
 0xe47   :  { %2800 = vtanh.f32 %v1369_v28 }
 0xe49   :  { %v1458_v31 = vpop.f32.mrb[14].mxu1 }
 0xe4a   :  { %v1462_v32 = vadd.f32 %v1458_v31, %v194_v29  ;;  %v2534_v33 = vpop.f32.mrb[15].mxu1 }
 0xe4c   :  { %2802 = vtanh.f32 %v1462_v32 }
 0xe51   :  { %v2801_v35 = vpop.eup %2800 }
 0xe52   :  { %1375 = vrot.lane.b32.xlu0 %v2801_v35, %s2855_s1  ;;  %v1371_v37 = vmul.f32 0.5, %v2801_v35 }
 0xe54   :  { %v1372_v38 = vadd.f32 0.5, %v1371_v37 }
 0xe56   :  { %v2803_v36 = vpop.eup %2802  ;;  %v1373_v44 = vmul.f32 %v1372_v38, %v1119_v3 }
 0xe57   :  { %1468 = vrot.lane.b32.xlu1 %v2803_v36, %s2855_s1  ;;  %v1464_v40 = vmul.f32 0.5, %v2803_v36 }
 0xe59   :  { %v1465_v42 = vadd.f32 0.5, %v1464_v40 }
 0xe5b   :  { %v1466_v47 = vmul.f32 %v1465_v42, %v3163_v5 }
 0xec4   :  { %v1376_v39 = vpop.permute.xlu0 %1375 }
 0xec5   :  { %v1378_v41 = vmul.f32 %v1376_v39, %v1372_v38 }
 0xec7   :  { %1380 = vrot.lane.b32.xlu0 %v1378_v41, %s2860_s4 }
 0xec9   :  { %v1469_v43 = vpop.permute.xlu1 %1468 }
 0xeca   :  { %v1471_v8 = vmul.f32 %v1469_v43, %v1465_v42 }
 0xecc   :  { %1473 = vrot.lane.b32.xlu1 %v1471_v8, %s2860_s4 }
 0xf39   :  { %v1381_v45 = vpop.permute.xlu0 %1380 }
 0xf3a   :  { %v1383_v46 = vadd.f32 %v1381_v45, %v1373_v44 }
 0xf3c   :  { %2804 = vtanh.f32 %v1383_v46 }
 0xf3e   :  { %v1474_v48 = vpop.permute.xlu1 %1473 }
 0xf3f   :  { %v1476_v49 = vadd.f32 %v1474_v48, %v1466_v47 }
 0xf41   :  { %2806 = vtanh.f32 %v1476_v49 }
 0xf46   :  { %v2805_v50 = vpop.eup %2804 }
 0xf47   :  { %1386 = vrot.lane.b32.xlu0 %v2805_v50, %s2855_s1 }
 0xf4b   :  { %v2807_v51 = vpop.eup %2806 }
 0xf4c   :  { %1479 = vrot.lane.b32.xlu1 %v2807_v51, %s2855_s1 }
 0xfb9   :  { %v1387_v52 = vpop.permute.xlu0 %1386 }
 0xfba   :  { %v1389_v53 = vmul.f32 %v1387_v52, %v1372_v38 }
 0xfbc   :  { %1484 = vrot.lane.b32.xlu0 %v1389_v53, %s2860_s4 }
 0xfbe   :  { %v1480_v55 = vpop.permute.xlu1 %1479 }
 0xfbf   :  { %v1482_v56 = vmul.f32 %v1480_v55, %v1465_v42 }
 0xfc1   :  { %1559 = vrot.lane.b32.xlu1 %v1482_v56, %s2860_s4 }
0x102e   :  { %v1485_v57 = vpop.permute.xlu0 %1484 }
0x102f   :  { %2544 = vmatmul.mubr.msk.f32.vlgmr.msra.gmra.mrb[20].mxu0 %vm239_vm2, %v1485_v57 }
0x1030   :  { %2721 = vmatpush3.bf16.msra.mxu0 %v2977_v26  ;;  %2565 = vmatprep.mubr.msk.f32.mxu0 %vm2857_vm1, %v2858_v19 }
0x1031   :  { %2722 = vmatprep.subr.bf16.mxu0 %v2856_v16 }
0x1033   :  { %v1560_v58 = vpop.permute.xlu1 %1559 }
0x1034   :  { %2724 = vmatpush3.bf16.msra.mxu0 %v2987_v30  ;;  %2555 = vmatmul.mubr.msk.f32.vlgmr.msra.gmra.mrb[16].mxu1 %vm239_vm2, %v1560_v58 }
0x1035   :  { %2727 = vmatpush3.bf16.msra.mxu1 %v3025_v54  ;;  %2731 = vmatprep.subr.bf16.mxu0 %v2856_v16 }
0x1036   :  { %2728 = vmatprep.subr.bf16.mxu1 %v2856_v16  ;;  %2576 = vmatprep.mubr.msk.f32.mxu1 %vm2857_vm1, %v2858_v19 }
0x1037   :  { %2566 = vmatmul.mubr.msk.f32.vlgmr.msra.gmra.mrb[22].mxu0 %vm239_vm2, %v1560_v58 }
0x1038   :  { %2733 = vmatpush3.bf16.msra.mxu0 %v2954_v17  ;;  %2587 = vmatprep.mubr.msk.f32.mxu0 %vm2857_vm1, %v2858_v19 }
0x1039   :  { %2730 = vmatpush3.bf16.msra.mxu1 %v3042_v0  ;;  %2734 = vmatprep.subr.bf16.mxu0 %v2856_v16 }
0x103a   :  { %2737 = vmatprep.subr.bf16.mxu1 %v2856_v16 }
0x103c   :  { %2736 = vmatpush3.bf16.msra.mxu0 %v2963_v20 }
0x103d   :  { %2743 = vmatprep.subr.bf16.mxu0 %v2856_v16 }
0x1102   :  { %v1554_v9 = vpop.f32.mrb[20].mxu0 }
0x1103   :  { %v2545_v59 = vpop.f32.mrb[21].mxu0 }
0x1107   :  { %v1629_v60 = vpop.f32.mrb[16].mxu1 }
0x1108   :  { %v1630_v61 = vadd.f32 %v1629_v60, %v1554_v9  ;;  %v2556_v62 = vpop.f32.mrb[17].mxu1 }
0x110a   :  { %v1633_v1 = vadd.f32 %v3005_v34, %v1630_v61  ;;  %v1722_v2 = vpop.f32.mrb[22].mxu0 }
0x110b   :  { %v1726_v3 = vadd.f32 %v1722_v2, %v199_v63  ;;  %v2567_v5 = vpop.f32.mrb[23].mxu0 }
0x110c   :  { %2808 = vtanh.f32 %v1633_v1 }
0x110d   :  { %2810 = vtanh.f32 %v1726_v3 }
0x1116   :  { %v2809_v7 = vpop.eup %2808 }
0x1117   :  { %v2811_v10 = vpop.eup %2810  ;;  %1639 = vrot.lane.b32.xlu0 %v2809_v7, %s2855_s1  ;;  %v1635_v11 = vmul.f32 0.5, %v2809_v7 }
0x1118   :  { %1732 = vrot.lane.b32.xlu1 %v2811_v10, %s2855_s1  ;;  %v1728_v12 = vmul.f32 0.5, %v2811_v10 }
0x1119   :  { %v1636_v15 = vadd.f32 0.5, %v1635_v11 }
0x111a   :  { %v1729_v18 = vadd.f32 0.5, %v1728_v12 }
0x111b   :  { %v1637_v24 = vmul.f32 %v1636_v15, %v1383_v46 }
0x111c   :  { %v1730_v6 = vmul.f32 %v1729_v18, %v1476_v49 }
0x1189   :  { %v1640_v21 = vpop.permute.xlu0 %1639 }
0x118a   :  { %v1733_v22 = vpop.permute.xlu1 %1732  ;;  %v1642_v14 = vmul.f32 %v1640_v21, %v1636_v15  ;;  %v2246_v21 = vld [vmem:[%s3287_s7] ss:$0 sm:$0xff] }
0x118b   :  { %v1735_v23 = vmul.f32 %v1733_v22, %v1729_v18 }
0x118c   :  { %1644 = vrot.lane.b32.xlu0 %v1642_v14, %s2860_s4 }
0x118d   :  { %1737 = vrot.lane.b32.xlu1 %v1735_v23, %s2860_s4 }
0x11fe   :  { %v1645_v25 = vpop.permute.xlu0 %1644 }
0x11ff   :  { %v1738_v27 = vpop.permute.xlu1 %1737  ;;  %v1647_v28 = vadd.f32 %v1645_v25, %v1637_v24 }
0x1200   :  { %v1740_v29 = vadd.f32 %v1738_v27, %v1730_v6 }
0x1201   :  { %2812 = vtanh.f32 %v1647_v28 }
0x1202   :  { %2814 = vtanh.f32 %v1740_v29 }
0x120b   :  { %v2813_v31 = vpop.eup %2812 }
0x120c   :  { %v2815_v32 = vpop.eup %2814  ;;  %1650 = vrot.lane.b32.xlu0 %v2813_v31, %s2855_s1  ;;  %v2247_v31 = vld [vmem:[#allocation3] ss:$0 sm:$0xff] }
0x120d   :  { %1743 = vrot.lane.b32.xlu1 %v2815_v32, %s2855_s1 }
0x127e   :  { %v1651_v33 = vpop.permute.xlu0 %1650 }
0x127f   :  { %v1744_v35 = vpop.permute.xlu1 %1743  ;;  %v1653_v36 = vmul.f32 %v1651_v33, %v1636_v15 }
0x1280   :  { %v1746_v37 = vmul.f32 %v1744_v35, %v1729_v18 }
0x1281   :  { %1748 = vrot.lane.b32.xlu0 %v1653_v36, %s2860_s4 }
0x1282   :  { %1823 = vrot.lane.b32.xlu1 %v1746_v37, %s2860_s4 }
0x12f3   :  { %v1749_v38 = vpop.permute.xlu0 %1748 }
0x12f4   :  { %v1824_v39 = vpop.permute.xlu1 %1823  ;;  %2577 = vmatmul.mubr.msk.f32.vlgmr.msra.gmra.mrb[18].mxu1 %vm239_vm2, %v1749_v38 }
0x12f5   :  { %2588 = vmatmul.mubr.msk.f32.vlgmr.msra.gmra.mrb[24].mxu0 %vm239_vm2, %v1824_v39  ;;  %2739 = vmatpush3.bf16.msra.mxu1 %v2977_v26 }
0x12f6   :  { %2740 = vmatprep.subr.bf16.mxu1 %v2856_v16  ;;  %2598 = vmatprep.mubr.msk.f32.mxu1 %vm2857_vm1, %v2858_v19 }
0x12f7   :  { %2745 = vmatpush3.bf16.msra.mxu0 %v3025_v54  ;;  %2609 = vmatprep.mubr.msk.f32.mxu0 %vm2857_vm1, %v2858_v19 }
0x12f8   :  { %2746 = vmatprep.subr.bf16.mxu0 %v2856_v16 }
0x12f9   :  { %2742 = vmatpush3.bf16.msra.mxu1 %v2987_v30 }
0x12fa   :  { %2749 = vmatprep.subr.bf16.mxu1 %v2856_v16 }
0x12fb   :  { %2748 = vmatpush3.bf16.msra.mxu0 %v3042_v0  ;;  %v204_v0 = vadd.f32 %v3068_v13, %v2940_v4 }
0x12fc   :  { %2599 = vmatmul.mubr.msk.f32.vlgmr.msra.gmra.mrb[20].mxu1 %vm239_vm2, %v1824_v39 }
0x12fd   :  { %2751 = vmatpush3.bf16.msra.mxu1 %v2954_v17  ;;  %2620 = vmatprep.mubr.msk.f32.mxu1 %vm2857_vm1, %v2858_v19 }
0x12fe   :  { %2752 = vmatprep.subr.bf16.mxu1 %v2856_v16 }
0x1301   :  { %2754 = vmatpush3.bf16.msra.mxu1 %v2963_v20 }
0x13c7   :  { %v1818_v26 = vpop.f32.mrb[18].mxu1 }
0x13c8   :  { %v1893_v54 = vpop.f32.mrb[24].mxu0  ;;  %v2578_v40 = vpop.f32.mrb[19].mxu1 }
0x13c9   :  { %v1894_v41 = vadd.f32 %v1893_v54, %v1818_v26  ;;  %v2589_v30 = vpop.f32.mrb[25].mxu0 }
0x13cb   :  { %v1897_v42 = vadd.f32 %v3005_v34, %v1894_v41 }
0x13cd   :  { %2816 = vtanh.f32 %v1897_v42 }
0x13cf   :  { %v1986_v43 = vpop.f32.mrb[20].mxu1 }
0x13d0   :  { %v1990_v17 = vadd.f32 %v1986_v43, %v204_v0  ;;  %v2600_v8 = vpop.f32.mrb[21].mxu1 }
0x13d2   :  { %2818 = vtanh.f32 %v1990_v17 }
0x13d7   :  { %v2817_v19 = vpop.eup %2816 }
0x13d8   :  { %1903 = vrot.lane.b32.xlu0 %v2817_v19, %s2855_s1  ;;  %v1899_v20 = vmul.f32 0.5, %v2817_v19 }
0x13da   :  { %v1900_v44 = vadd.f32 0.5, %v1899_v20 }
0x13dc   :  { %v2819_v16 = vpop.eup %2818  ;;  %v1901_v13 = vmul.f32 %v1900_v44, %v1647_v28 }
0x13dd   :  { %1996 = vrot.lane.b32.xlu1 %v2819_v16, %s2855_s1  ;;  %v1992_v46 = vmul.f32 0.5, %v2819_v16 }
0x13df   :  { %v1993_v48 = vadd.f32 0.5, %v1992_v46 }
0x13e1   :  { %v1994_v52 = vmul.f32 %v1993_v48, %v1740_v29 }
0x144a   :  { %v1904_v45 = vpop.permute.xlu0 %1903 }
0x144b   :  { %v1906_v47 = vmul.f32 %v1904_v45, %v1900_v44 }
0x144d   :  { %1908 = vrot.lane.b32.xlu0 %v1906_v47, %s2860_s4 }
0x144f   :  { %v1997_v49 = vpop.permute.xlu1 %1996 }
0x1450   :  { %v1999_v4 = vmul.f32 %v1997_v49, %v1993_v48 }
0x1452   :  { %2001 = vrot.lane.b32.xlu1 %v1999_v4, %s2860_s4 }
0x14bf   :  { %v1909_v50 = vpop.permute.xlu0 %1908 }
0x14c0   :  { %v1911_v51 = vadd.f32 %v1909_v50, %v1901_v13 }
0x14c2   :  { %2820 = vtanh.f32 %v1911_v51 }
0x14c4   :  { %v2002_v53 = vpop.permute.xlu1 %2001 }
0x14c5   :  { %v2004_v55 = vadd.f32 %v2002_v53, %v1994_v52 }
0x14c7   :  { %2822 = vtanh.f32 %v2004_v55 }
0x14cc   :  { %v2821_v56 = vpop.eup %2820 }
0x14cd   :  { %1914 = vrot.lane.b32.xlu0 %v2821_v56, %s2855_s1 }
0x14d1   :  { %v2823_v57 = vpop.eup %2822 }
0x14d2   :  { %2007 = vrot.lane.b32.xlu1 %v2823_v57, %s2855_s1 }
0x153f   :  { %v1915_v58 = vpop.permute.xlu0 %1914 }
0x1540   :  { %v1917_v9 = vmul.f32 %v1915_v58, %v1900_v44 }
0x1542   :  { %2012 = vrot.lane.b32.xlu0 %v1917_v9, %s2860_s4 }
0x1544   :  { %v2008_v59 = vpop.permute.xlu1 %2007 }
0x1545   :  { %v2010_v60 = vmul.f32 %v2008_v59, %v1993_v48 }
0x1547   :  { %2087 = vrot.lane.b32.xlu1 %v2010_v60, %s2860_s4 }
0x15b4   :  { %v2013_v61 = vpop.permute.xlu0 %2012 }
0x15b5   :  { %2610 = vmatmul.mubr.msk.f32.vlgmr.msra.gmra.mrb[26].mxu0 %vm239_vm2, %v2013_v61 }
0x15b9   :  { %v2088_v62 = vpop.permute.xlu1 %2087 }
0x15ba   :  { %2621 = vmatmul.mubr.msk.f32.vlgmr.msra.gmra.mrb[22].mxu1 %vm239_vm2, %v2088_v62 }
0x1688   :  { %v2082_v63 = vpop.f32.mrb[26].mxu0 }
0x1689   :  { %v2611_v1 = vpop.f32.mrb[27].mxu0 }
0x168d   :  { %v2157_v2 = vpop.f32.mrb[22].mxu1 }
0x168e   :  { %v2158_v3 = vadd.f32 %v2157_v2, %v2082_v63  ;;  %v2622_v5 = vpop.f32.mrb[23].mxu1 }
0x1690   :  { %v2161_v7 = vadd.f32 %v3005_v34, %v2158_v3 }
0x1692   :  { %2824 = vtanh.f32 %v2161_v7 }
0x169c   :  { %v2825_v10 = vpop.eup %2824 }
0x169d   :  { %2167 = vrot.lane.b32.xlu0 %v2825_v10, %s2855_s1  ;;  %v2163_v11 = vmul.f32 0.5, %v2825_v10 }
0x169f   :  { %v2164_v12 = vadd.f32 0.5, %v2163_v11 }
0x16a1   :  { %v2165_v22 = vmul.f32 %v2164_v12, %v1911_v51 }
0x170f   :  { %v2168_v15 = vpop.permute.xlu0 %2167 }
0x1710   :  { %v2170_v18 = vmul.f32 %v2168_v15, %v2164_v12 }
0x1712   :  { %2172 = vrot.lane.b32.xlu1 %v2170_v18, %s2860_s4 }
0x1716   :  { %2188 = vrot.lane.b32.xlu1 %v2246_v21, %s2859_s17 }
0x1784   :  { %v2173_v14 = vpop.permute.xlu1 %2172 }
0x1785   :  { %v2175_v23 = vadd.f32 %v2173_v14, %v2165_v22 }
0x1787   :  { %2826 = vtanh.f32 %v2175_v23 }
0x1788   :  { %v2189_v6 = vpop.permute.xlu1 %2188 }
0x1791   :  { %v2827_v34 = vpop.eup %2826 }
0x1792   :  { %2178 = vrot.lane.b32.xlu0 %v2827_v34, %s2855_s1 }
0x1804   :  { %v2179_v24 = vpop.permute.xlu0 %2178 }
0x1805   :  { %v2181_v25 = vmul.f32 %v2179_v24, %v2164_v12 }
0x1807   :  { %v2191_v27 = vmul.f32 %v2189_v6, %v2181_v25 }
0x1809   :  { %2193 = vrot.lane.b32.xlu0 %v2191_v27, %s2860_s4 }
0x187b   :  { %v2194_v28 = vpop.permute.xlu0 %2193 }
0x187c   :  { %v2196_v29 = vsel %vm239_vm2, %v2194_v28, 0.0 }
0x187d   :  { %2197 = vadd.xlane.f32.xlu1 %v2196_v29 }
0x190a   :  { %v2198_v32 = vpop.xlane.xlu1 %2197 }
0x190b   :  { %v2206_v33 = vadd.f32 %v2247_v31, %v2198_v32 }
0x190d   :  { %2208 = vst.msk [vmem:[%s3289_s9] sm:$0xff] %vm2207_vm3, %v2206_v33 }
0x190e   :  { %2213 = vsyncpa [#allocation5], 1 }

</bundles_post_ra>
